<compile_context>
chip_gen: v5e
topology: v5e:2x2
jax: 0.10.0
libtpu: 0.0.40
codegen_flags: <defaults>
</compile_context>

<pallas_src>
import jax
import jax.numpy as jnp
from jax.experimental import pallas as pl
from jax.experimental.pallas import tpu as pltpu


# ----------------------------- Pallas kernel --------------------------------

def cnn_fused_kernel(x_ref, wbig_ref, cbias_ref, fcw_ref, fcb_ref,
                     out_ref, hs_ref, flat_ref):
    # x_ref    : (nb*H, W*C)     bf16  NHWC rows of nb images stacked
    # wbig_ref : (KH, W*C, P)    bf16  conv weight, kw + c_in folded in; P padded
    # cbias_ref: (1, P)          f32   conv bias tiled over ow (zero in pad cols)
    # fcw_ref  : (n_cls, OH*P)   bf16  lane-dense fc weight (zero in pad cols)
    # fcb_ref  : (1, n_cls)      f32
    # out_ref  : (nb, n_cls)     f32   log-probabilities
    # hs_ref   : (nb*H-KH+1, P)  f32   scratch: ReLU'd conv rows
    # flat_ref : (nb, OH*P)      f32   scratch: per-image flattened activation
    kh_dim, _, p_dim = wbig_ref.shape
    nb = out_ref.shape[0]
    h_dim = x_ref.shape[0] // nb
    r2 = hs_ref.shape[0]                      # nb*H - KH + 1 valid+garbage rows
    oh_dim = flat_ref.shape[1] // p_dim

    # ---- conv: KH shifted-window matmuls over every image row at once ----
    cbias = cbias_ref[...]                    # hoisted single load
    acc = jnp.dot(x_ref[0:r2, :], wbig_ref[0],
                  preferred_element_type=jnp.float32)
    for kh in range(1, kh_dim):
        acc = acc + jnp.dot(x_ref[kh:kh + r2, :], wbig_ref[kh],
                            preferred_element_type=jnp.float32)
    hs_ref[...] = jnp.maximum(acc + cbias, 0.0)

    # ---- flatten: pack the OH valid rows of each image side by side ----
    # Rows n*H + oh with oh >= OH mix adjacent images and are never read.
    # TODO(synk): for large nb/OH use one strided read per oh (nb rows, stride H)
    # instead of nb*OH single-row copies.
    for n in range(nb):
        for oh in range(oh_dim):
            flat_ref[n, oh * p_dim:(oh + 1) * p_dim] = hs_ref[n * h_dim + oh, :]

    # ---- FC: ONE contraction over the lane axis of both operands ----
    logits = jax.lax.dot_general(
        flat_ref[...].astype(jnp.bfloat16), fcw_ref[...],
        dimension_numbers=(((1,), (1,)), ((), ())),
        preferred_element_type=jnp.float32)
    logits = logits + fcb_ref[...]

    # ---- numerically-stable log_softmax over classes (f32) ----
    m = jnp.max(logits, axis=-1, keepdims=True)
    z = logits - m
    lse = jnp.log(jnp.sum(jnp.exp(z), axis=-1, keepdims=True))
    out_ref[...] = z - lse


# ------------------------ one-time weight relayout ---------------------------

def prepare_params(conv_w, conv_b, fc_w, fc_b, H, W):
    """Init-time relayout: fold kw/c_in into the conv weight, pad the (ow, c_out)
    column axis to a lane multiple, and store the FC weight lane-dense in bf16."""
    C_out, C, KH, KW = conv_w.shape
    OH, OW = H - KH + 1, W - KW + 1
    n_classes = fc_w.shape[0]

    P = -(-(OW * C_out) // 128) * 128          # pad OW*C_out (448) -> 512
    assert P % C_out == 0
    OWp = P // C_out

    # WBIG[kh, w*C + c, ow*C_out + co] = conv_w[co, c, kh, w - ow]  (0<=w-ow<KW)
    kw_rel = jnp.arange(W)[:, None] - jnp.arange(OW)[None, :]       # (W, OW)
    valid = (kw_rel >= 0) & (kw_rel < KW)
    kw_cl = jnp.clip(kw_rel, 0, KW - 1)
    wt = conv_w.transpose(2, 1, 3, 0)                               # (KH,C,KW,C_out)
    t = wt[:, :, kw_cl, :]                                          # (KH,C,W,OW,C_out)
    t = t * valid[None, None, :, :, None].astype(wt.dtype)
    t = t.transpose(0, 2, 1, 3, 4)                                  # (KH,W,C,OW,C_out)
    t = jnp.pad(t, ((0, 0), (0, 0), (0, 0), (0, OWp - OW), (0, 0)))
    wbig = t.reshape(KH, W * C, P).astype(jnp.bfloat16)

    # conv bias tiled over the (ow, co) column layout, zero in pad columns
    cbias = jnp.pad(jnp.tile(conv_b, OW), (0, (OWp - OW) * C_out))
    cbias = cbias.reshape(1, P).astype(jnp.float32)

    # fc_w[cls, co*OH*OW + oh*OW + ow]  ->  fcw2[cls, oh*P + ow*C_out + co]
    f = fc_w.reshape(n_classes, C_out, OH, OW).transpose(0, 2, 3, 1)  # (cls,oh,ow,co)
    f = jnp.pad(f, ((0, 0), (0, 0), (0, OWp - OW), (0, 0)))
    fcw2 = f.reshape(n_classes, OH * P).astype(jnp.bfloat16)

    fcb = fc_b.reshape(1, n_classes).astype(jnp.float32)
    return wbig, cbias, fcw2, fcb


# ----------------------------- Forward pass ----------------------------------

@jax.jit
def cnn_forward(x, wbig, cbias, fcw2, fcb):
    """x: (N, C_in, H, W) f32  ->  (N, n_classes) f32 log-probabilities."""
    N, C, H, W = x.shape
    KH, WC, P = wbig.shape
    n_cls = fcw2.shape[0]
    OH = fcw2.shape[1] // P

    # Batch block: 8 images per grid step when possible (sublane-aligned rows);
    # weights use constant index_maps so they stay VMEM-resident across steps.
    nb = 8 if N % 8 == 0 else N
    grid = (N // nb,)

    # Row layout + bf16 cast of the raw input; fused into the pallas_call via
    # allow_input_fusion so it does not cost a separate XLA kernel launch.
    x_r = jnp.transpose(x, (0, 2, 3, 1)).reshape(N * H, W * C).astype(jnp.bfloat16)

    return pl.pallas_call(
        cnn_fused_kernel,
        out_shape=jax.ShapeDtypeStruct((N, n_cls), jnp.float32),
        grid=grid,
        in_specs=[
            pl.BlockSpec((nb * H, WC), lambda b: (b, 0)),
            pl.BlockSpec((KH, WC, P), lambda b: (0, 0, 0)),
            pl.BlockSpec((1, P), lambda b: (0, 0)),
            pl.BlockSpec((n_cls, OH * P), lambda b: (0, 0)),
            pl.BlockSpec((1, n_cls), lambda b: (0, 0)),
        ],
        out_specs=pl.BlockSpec((nb, n_cls), lambda b: (b, 0)),
        scratch_shapes=[
            pltpu.VMEM((nb * H - KH + 1, P), jnp.float32),
            pltpu.VMEM((nb, OH * P), jnp.float32),
        ],
        compiler_params=pltpu.CompilerParams(
            dimension_semantics=("parallel",),
            allow_input_fusion=[True, False, False, False, False],
        ),
    )(x_r, wbig, cbias, fcw2, fcb)


# ----------------------------- Reference (pure JAX) --------------------------

def reference_forward(x, conv_w, conv_b, fc_w, fc_b):
    conv = jax.lax.conv_general_dilated(
        x, conv_w, window_strides=(1, 1), padding="VALID",
        dimension_numbers=("NCHW", "OIHW", "NCHW"),
        precision=jax.lax.Precision.HIGHEST)
    act = jax.nn.relu(conv + conv_b[None, :, None, None])
    feat = act.reshape(act.shape[0], -1)                 # NCHW flatten
    logits = jnp.dot(feat, fc_w.T, precision=jax.lax.Precision.HIGHEST) + fc_b
    return jax.nn.log_softmax(logits, axis=-1)


# ----------------------------- Param init ------------------------------------

def init_params(key, f_in, n_classes, OH, OW):
    C_out, KH, KW = 32, 3, 3
    D = C_out * OH * OW
    k1, k2, k3, k4 = jax.random.split(key, 4)
    conv_bound = 1.0 / jnp.sqrt(f_in * KH * KW)
    fc_bound = 1.0 / jnp.sqrt(D)
    conv_w = jax.random.uniform(k1, (C_out, f_in, KH, KW), jnp.float32,
                                -conv_bound, conv_bound)
    conv_b = jax.random.uniform(k2, (C_out,), jnp.float32, -conv_bound, conv_bound)
    fc_w = jax.random.uniform(k3, (n_classes, D), jnp.float32, -fc_bound, fc_bound)
    fc_b = jax.random.uniform(k4, (n_classes,), jnp.float32, -fc_bound, fc_bound)
    return conv_w, conv_b, fc_w, fc_b


# ----------------------------- Main -------------------------------------------

if __name__ == "__main__":
    key = jax.random.PRNGKey(0)
    k_x, k_p = jax.random.split(key)

    N, f_in, H, W = 2, 4, 16, 16
    n_classes = 10
    KH = KW = 3
    OH, OW = H - KH + 1, W - KW + 1

    x = jax.random.normal(k_x, (N, f_in, H, W), jnp.float32)
    conv_w, conv_b, fc_w, fc_b = init_params(k_p, f_in, n_classes, OH, OW)

    # one-time weight relayout (would live in module init in a real model)
    params = prepare_params(conv_w, conv_b, fc_w, fc_b, H, W)

    out = cnn_forward(x, *params)
    out = jax.block_until_ready(out)

    assert out.shape == (N, n_classes)
    # log_softmax rows must (approximately) exponentiate-sum to 1
    assert jnp.allclose(jnp.sum(jnp.exp(out), axis=1), 1.0, atol=1e-4)

    # end-to-end correctness vs. pure-JAX f32 reference of the PyTorch forward
    # (kernel uses bf16 MXU inputs with f32 accumulation)
    ref = reference_forward(x, conv_w, conv_b, fc_w, fc_b)
    max_err = float(jnp.max(jnp.abs(out - ref)))
    assert jnp.allclose(out, ref, atol=2e-2, rtol=2e-2), max_err

    print("KERNEL_OK")
</pallas_src>

<mosaic_0001>
module attributes {stable_mosaic.version = 11 : i64} {
  func.func @cnn_fused_kernel(%arg0: i32, %arg1: memref<32x64xbf16, #tpu.memory_space<vmem>>, %arg2: memref<3x64x512xbf16, #tpu.memory_space<vmem>>, %arg3: memref<1x512xf32, #tpu.memory_space<vmem>>, %arg4: memref<10x7168xbf16, #tpu.memory_space<vmem>>, %arg5: memref<1x10xf32, #tpu.memory_space<vmem>>, %arg6: memref<2x10xf32, #tpu.memory_space<vmem>>, %arg7: memref<30x512xf32, #tpu.memory_space<vmem>>, %arg8: memref<2x7168xf32, #tpu.memory_space<vmem>>) attributes {dimension_semantics = [#tpu.dimension_semantics<parallel>], iteration_bounds = array<i64: 1>, scalar_prefetch = 0 : i64, scratch_operands = 2 : i64, tpu.core_type = #tpu.core_type<tc>, window_params = [{transform_indices = @transform_0, window_bounds = array<i64: 32, 64>}, {pipeline_mode = #tpu.pipeline_mode<synchronous>, transform_indices = @transform_1, window_bounds = array<i64: 3, 64, 512>}, {pipeline_mode = #tpu.pipeline_mode<synchronous>, transform_indices = @transform_2, window_bounds = array<i64: 1, 512>}, {pipeline_mode = #tpu.pipeline_mode<synchronous>, transform_indices = @transform_3, window_bounds = array<i64: 10, 7168>}, {pipeline_mode = #tpu.pipeline_mode<synchronous>, transform_indices = @transform_4, window_bounds = array<i64: 1, 10>}, {transform_indices = @transform_5, window_bounds = array<i64: 2, 10>}]} {
    %c0 = arith.constant 0 : index
    %c0_0 = arith.constant 0 : index
    %0 = vector.load %arg3[%c0, %c0_0] : memref<1x512xf32, #tpu.memory_space<vmem>>, vector<1x512xf32>
    %c0_1 = arith.constant 0 : index
    %c0_2 = arith.constant 0 : index
    %1 = vector.load %arg1[%c0_1, %c0_2] : memref<32x64xbf16, #tpu.memory_space<vmem>>, vector<30x64xbf16>
    %c0_3 = arith.constant 0 : index
    %c0_4 = arith.constant 0 : index
    %c0_5 = arith.constant 0 : index
    %2 = vector.load %arg2[%c0_3, %c0_4, %c0_5] : memref<3x64x512xbf16, #tpu.memory_space<vmem>>, vector<1x64x512xbf16>
    %3 = vector.shape_cast %2 : vector<1x64x512xbf16> to vector<64x512xbf16>
    %cst = arith.constant dense<0.000000e+00> : vector<30x512xf32>
    %4 = tpu.matmul %1, %3, %cst {dimension_numbers = #tpu.dot_dimension_numbers<[1], [0], [0], [1], [0, 0, 1, 1], [], []>} : vector<30x64xbf16>, vector<64x512xbf16>, vector<30x512xf32> -> vector<30x512xf32>
    %c1 = arith.constant 1 : index
    %c0_6 = arith.constant 0 : index
    %5 = vector.load %arg1[%c1, %c0_6] : memref<32x64xbf16, #tpu.memory_space<vmem>>, vector<30x64xbf16>
    %c1_7 = arith.constant 1 : index
    %c0_8 = arith.constant 0 : index
    %c0_9 = arith.constant 0 : index
    %6 = vector.load %arg2[%c1_7, %c0_8, %c0_9] : memref<3x64x512xbf16, #tpu.memory_space<vmem>>, vector<1x64x512xbf16>
    %7 = vector.shape_cast %6 : vector<1x64x512xbf16> to vector<64x512xbf16>
    %cst_10 = arith.constant dense<0.000000e+00> : vector<30x512xf32>
    %8 = tpu.matmul %5, %7, %cst_10 {dimension_numbers = #tpu.dot_dimension_numbers<[1], [0], [0], [1], [0, 0, 1, 1], [], []>} : vector<30x64xbf16>, vector<64x512xbf16>, vector<30x512xf32> -> vector<30x512xf32>
    %9 = arith.addf %4, %8 : vector<30x512xf32>
    %c2 = arith.constant 2 : index
    %c0_11 = arith.constant 0 : index
    %10 = vector.load %arg1[%c2, %c0_11] : memref<32x64xbf16, #tpu.memory_space<vmem>>, vector<30x64xbf16>
    %c2_12 = arith.constant 2 : index
    %c0_13 = arith.constant 0 : index
    %c0_14 = arith.constant 0 : index
    %11 = vector.load %arg2[%c2_12, %c0_13, %c0_14] : memref<3x64x512xbf16, #tpu.memory_space<vmem>>, vector<1x64x512xbf16>
    %12 = vector.shape_cast %11 : vector<1x64x512xbf16> to vector<64x512xbf16>
    %cst_15 = arith.constant dense<0.000000e+00> : vector<30x512xf32>
    %13 = tpu.matmul %10, %12, %cst_15 {dimension_numbers = #tpu.dot_dimension_numbers<[1], [0], [0], [1], [0, 0, 1, 1], [], []>} : vector<30x64xbf16>, vector<64x512xbf16>, vector<30x512xf32> -> vector<30x512xf32>
    %14 = arith.addf %9, %13 : vector<30x512xf32>
    %15 = vector.broadcast %0 : vector<1x512xf32> to vector<30x512xf32>
    %16 = arith.addf %14, %15 : vector<30x512xf32>
    %cst_16 = arith.constant 0.000000e+00 : f32
    %17 = vector.broadcast %cst_16 : f32 to vector<30x512xf32>
    %18 = arith.maximumf %16, %17 : vector<30x512xf32>
    %c0_17 = arith.constant 0 : index
    %c0_18 = arith.constant 0 : index
    %19 = vector.load %arg7[%c0_17, %c0_18] : memref<30x512xf32, #tpu.memory_space<vmem>>, vector<30x512xf32>
    tpu.vector_store %arg7[%c0_17, %c0_18], %18 {strides = array<i32>} : memref<30x512xf32, #tpu.memory_space<vmem>>, vector<30x512xf32>,
    %c0_19 = arith.constant 0 : index
    %c0_20 = arith.constant 0 : index
    %20 = vector.load %arg7[%c0_19, %c0_20] : memref<30x512xf32, #tpu.memory_space<vmem>>, vector<1x512xf32>
    %21 = vector.shape_cast %20 : vector<1x512xf32> to vector<512xf32>
    %c0_21 = arith.constant 0 : index
    %c0_22 = arith.constant 0 : index
    %22 = vector.load %arg8[%c0_21, %c0_22] : memref<2x7168xf32, #tpu.memory_space<vmem>>, vector<1x512xf32>
    %23 = vector.shape_cast %22 : vector<1x512xf32> to vector<512xf32>
    %24 = vector.shape_cast %21 : vector<512xf32> to vector<1x512xf32>
    tpu.vector_store %arg8[%c0_21, %c0_22], %24 {strides = array<i32>} : memref<2x7168xf32, #tpu.memory_space<vmem>>, vector<1x512xf32>,
    %c1_23 = arith.constant 1 : index
    %c0_24 = arith.constant 0 : index
    %25 = vector.load %arg7[%c1_23, %c0_24] : memref<30x512xf32, #tpu.memory_space<vmem>>, vector<1x512xf32>
    %26 = vector.shape_cast %25 : vector<1x512xf32> to vector<512xf32>
    %c0_25 = arith.constant 0 : index
    %c512 = arith.constant 512 : index
    %27 = vector.load %arg8[%c0_25, %c512] : memref<2x7168xf32, #tpu.memory_space<vmem>>, vector<1x512xf32>
    %28 = vector.shape_cast %27 : vector<1x512xf32> to vector<512xf32>
    %29 = vector.shape_cast %26 : vector<512xf32> to vector<1x512xf32>
    tpu.vector_store %arg8[%c0_25, %c512], %29 {strides = array<i32>} : memref<2x7168xf32, #tpu.memory_space<vmem>>, vector<1x512xf32>,
    %c2_26 = arith.constant 2 : index
    %c0_27 = arith.constant 0 : index
    %30 = vector.load %arg7[%c2_26, %c0_27] : memref<30x512xf32, #tpu.memory_space<vmem>>, vector<1x512xf32>
    %31 = vector.shape_cast %30 : vector<1x512xf32> to vector<512xf32>
    %c0_28 = arith.constant 0 : index
    %c1024 = arith.constant 1024 : index
    %32 = vector.load %arg8[%c0_28, %c1024] : memref<2x7168xf32, #tpu.memory_space<vmem>>, vector<1x512xf32>
    %33 = vector.shape_cast %32 : vector<1x512xf32> to vector<512xf32>
    %34 = vector.shape_cast %31 : vector<512xf32> to vector<1x512xf32>
    tpu.vector_store %arg8[%c0_28, %c1024], %34 {strides = array<i32>} : memref<2x7168xf32, #tpu.memory_space<vmem>>, vector<1x512xf32>,
    %c3 = arith.constant 3 : index
    %c0_29 = arith.constant 0 : index
    %35 = vector.load %arg7[%c3, %c0_29] : memref<30x512xf32, #tpu.memory_space<vmem>>, vector<1x512xf32>
    %36 = vector.shape_cast %35 : vector<1x512xf32> to vector<512xf32>
    %c0_30 = arith.constant 0 : index
    %c1536 = arith.constant 1536 : index
    %37 = vector.load %arg8[%c0_30, %c1536] : memref<2x7168xf32, #tpu.memory_space<vmem>>, vector<1x512xf32>
    %38 = vector.shape_cast %37 : vector<1x512xf32> to vector<512xf32>
    %39 = vector.shape_cast %36 : vector<512xf32> to vector<1x512xf32>
    tpu.vector_store %arg8[%c0_30, %c1536], %39 {strides = array<i32>} : memref<2x7168xf32, #tpu.memory_space<vmem>>, vector<1x512xf32>,
    %c4 = arith.constant 4 : index
    %c0_31 = arith.constant 0 : index
    %40 = vector.load %arg7[%c4, %c0_31] : memref<30x512xf32, #tpu.memory_space<vmem>>, vector<1x512xf32>
    %41 = vector.shape_cast %40 : vector<1x512xf32> to vector<512xf32>
    %c0_32 = arith.constant 0 : index
    %c2048 = arith.constant 2048 : index
    %42 = vector.load %arg8[%c0_32, %c2048] : memref<2x7168xf32, #tpu.memory_space<vmem>>, vector<1x512xf32>
    %43 = vector.shape_cast %42 : vector<1x512xf32> to vector<512xf32>
    %44 = vector.shape_cast %41 : vector<512xf32> to vector<1x512xf32>
    tpu.vector_store %arg8[%c0_32, %c2048], %44 {strides = array<i32>} : memref<2x7168xf32, #tpu.memory_space<vmem>>, vector<1x512xf32>,
    %c5 = arith.constant 5 : index
    %c0_33 = arith.constant 0 : index
    %45 = vector.load %arg7[%c5, %c0_33] : memref<30x512xf32, #tpu.memory_space<vmem>>, vector<1x512xf32>
    %46 = vector.shape_cast %45 : vector<1x512xf32> to vector<512xf32>
    %c0_34 = arith.constant 0 : index
    %c2560 = arith.constant 2560 : index
    %47 = vector.load %arg8[%c0_34, %c2560] : memref<2x7168xf32, #tpu.memory_space<vmem>>, vector<1x512xf32>
    %48 = vector.shape_cast %47 : vector<1x512xf32> to vector<512xf32>
    %49 = vector.shape_cast %46 : vector<512xf32> to vector<1x512xf32>
    tpu.vector_store %arg8[%c0_34, %c2560], %49 {strides = array<i32>} : memref<2x7168xf32, #tpu.memory_space<vmem>>, vector<1x512xf32>,
    %c6 = arith.constant 6 : index
    %c0_35 = arith.constant 0 : index
    %50 = vector.load %arg7[%c6, %c0_35] : memref<30x512xf32, #tpu.memory_space<vmem>>, vector<1x512xf32>
    %51 = vector.shape_cast %50 : vector<1x512xf32> to vector<512xf32>
    %c0_36 = arith.constant 0 : index
    %c3072 = arith.constant 3072 : index
    %52 = vector.load %arg8[%c0_36, %c3072] : memref<2x7168xf32, #tpu.memory_space<vmem>>, vector<1x512xf32>
    %53 = vector.shape_cast %52 : vector<1x512xf32> to vector<512xf32>
    %54 = vector.shape_cast %51 : vector<512xf32> to vector<1x512xf32>
    tpu.vector_store %arg8[%c0_36, %c3072], %54 {strides = array<i32>} : memref<2x7168xf32, #tpu.memory_space<vmem>>, vector<1x512xf32>,
    %c7 = arith.constant 7 : index
    %c0_37 = arith.constant 0 : index
    %55 = vector.load %arg7[%c7, %c0_37] : memref<30x512xf32, #tpu.memory_space<vmem>>, vector<1x512xf32>
    %56 = vector.shape_cast %55 : vector<1x512xf32> to vector<512xf32>
    %c0_38 = arith.constant 0 : index
    %c3584 = arith.constant 3584 : index
    %57 = vector.load %arg8[%c0_38, %c3584] : memref<2x7168xf32, #tpu.memory_space<vmem>>, vector<1x512xf32>
    %58 = vector.shape_cast %57 : vector<1x512xf32> to vector<512xf32>
    %59 = vector.shape_cast %56 : vector<512xf32> to vector<1x512xf32>
    tpu.vector_store %arg8[%c0_38, %c3584], %59 {strides = array<i32>} : memref<2x7168xf32, #tpu.memory_space<vmem>>, vector<1x512xf32>,
    %c8 = arith.constant 8 : index
    %c0_39 = arith.constant 0 : index
    %60 = vector.load %arg7[%c8, %c0_39] : memref<30x512xf32, #tpu.memory_space<vmem>>, vector<1x512xf32>
    %61 = vector.shape_cast %60 : vector<1x512xf32> to vector<512xf32>
    %c0_40 = arith.constant 0 : index
    %c4096 = arith.constant 4096 : index
    %62 = vector.load %arg8[%c0_40, %c4096] : memref<2x7168xf32, #tpu.memory_space<vmem>>, vector<1x512xf32>
    %63 = vector.shape_cast %62 : vector<1x512xf32> to vector<512xf32>
    %64 = vector.shape_cast %61 : vector<512xf32> to vector<1x512xf32>
    tpu.vector_store %arg8[%c0_40, %c4096], %64 {strides = array<i32>} : memref<2x7168xf32, #tpu.memory_space<vmem>>, vector<1x512xf32>,
    %c9 = arith.constant 9 : index
    %c0_41 = arith.constant 0 : index
    %65 = vector.load %arg7[%c9, %c0_41] : memref<30x512xf32, #tpu.memory_space<vmem>>, vector<1x512xf32>
    %66 = vector.shape_cast %65 : vector<1x512xf32> to vector<512xf32>
    %c0_42 = arith.constant 0 : index
    %c4608 = arith.constant 4608 : index
    %67 = vector.load %arg8[%c0_42, %c4608] : memref<2x7168xf32, #tpu.memory_space<vmem>>, vector<1x512xf32>
    %68 = vector.shape_cast %67 : vector<1x512xf32> to vector<512xf32>
    %69 = vector.shape_cast %66 : vector<512xf32> to vector<1x512xf32>
    tpu.vector_store %arg8[%c0_42, %c4608], %69 {strides = array<i32>} : memref<2x7168xf32, #tpu.memory_space<vmem>>, vector<1x512xf32>,
    %c10 = arith.constant 10 : index
    %c0_43 = arith.constant 0 : index
    %70 = vector.load %arg7[%c10, %c0_43] : memref<30x512xf32, #tpu.memory_space<vmem>>, vector<1x512xf32>
    %71 = vector.shape_cast %70 : vector<1x512xf32> to vector<512xf32>
    %c0_44 = arith.constant 0 : index
    %c5120 = arith.constant 5120 : index
    %72 = vector.load %arg8[%c0_44, %c5120] : memref<2x7168xf32, #tpu.memory_space<vmem>>, vector<1x512xf32>
    %73 = vector.shape_cast %72 : vector<1x512xf32> to vector<512xf32>
    %74 = vector.shape_cast %71 : vector<512xf32> to vector<1x512xf32>
    tpu.vector_store %arg8[%c0_44, %c5120], %74 {strides = array<i32>} : memref<2x7168xf32, #tpu.memory_space<vmem>>, vector<1x512xf32>,
    %c11 = arith.constant 11 : index
    %c0_45 = arith.constant 0 : index
    %75 = vector.load %arg7[%c11, %c0_45] : memref<30x512xf32, #tpu.memory_space<vmem>>, vector<1x512xf32>
    %76 = vector.shape_cast %75 : vector<1x512xf32> to vector<512xf32>
    %c0_46 = arith.constant 0 : index
    %c5632 = arith.constant 5632 : index
    %77 = vector.load %arg8[%c0_46, %c5632] : memref<2x7168xf32, #tpu.memory_space<vmem>>, vector<1x512xf32>
    %78 = vector.shape_cast %77 : vector<1x512xf32> to vector<512xf32>
    %79 = vector.shape_cast %76 : vector<512xf32> to vector<1x512xf32>
    tpu.vector_store %arg8[%c0_46, %c5632], %79 {strides = array<i32>} : memref<2x7168xf32, #tpu.memory_space<vmem>>, vector<1x512xf32>,
    %c12 = arith.constant 12 : index
    %c0_47 = arith.constant 0 : index
    %80 = vector.load %arg7[%c12, %c0_47] : memref<30x512xf32, #tpu.memory_space<vmem>>, vector<1x512xf32>
    %81 = vector.shape_cast %80 : vector<1x512xf32> to vector<512xf32>
    %c0_48 = arith.constant 0 : index
    %c6144 = arith.constant 6144 : index
    %82 = vector.load %arg8[%c0_48, %c6144] : memref<2x7168xf32, #tpu.memory_space<vmem>>, vector<1x512xf32>
    %83 = vector.shape_cast %82 : vector<1x512xf32> to vector<512xf32>
    %84 = vector.shape_cast %81 : vector<512xf32> to vector<1x512xf32>
    tpu.vector_store %arg8[%c0_48, %c6144], %84 {strides = array<i32>} : memref<2x7168xf32, #tpu.memory_space<vmem>>, vector<1x512xf32>,
    %c13 = arith.constant 13 : index
    %c0_49 = arith.constant 0 : index
    %85 = vector.load %arg7[%c13, %c0_49] : memref<30x512xf32, #tpu.memory_space<vmem>>, vector<1x512xf32>
    %86 = vector.shape_cast %85 : vector<1x512xf32> to vector<512xf32>
    %c0_50 = arith.constant 0 : index
    %c6656 = arith.constant 6656 : index
    %87 = vector.load %arg8[%c0_50, %c6656] : memref<2x7168xf32, #tpu.memory_space<vmem>>, vector<1x512xf32>
    %88 = vector.shape_cast %87 : vector<1x512xf32> to vector<512xf32>
    %89 = vector.shape_cast %86 : vector<512xf32> to vector<1x512xf32>
    tpu.vector_store %arg8[%c0_50, %c6656], %89 {strides = array<i32>} : memref<2x7168xf32, #tpu.memory_space<vmem>>, vector<1x512xf32>,
    %c16 = arith.constant 16 : index
    %c0_51 = arith.constant 0 : index
    %90 = vector.load %arg7[%c16, %c0_51] : memref<30x512xf32, #tpu.memory_space<vmem>>, vector<1x512xf32>
    %91 = vector.shape_cast %90 : vector<1x512xf32> to vector<512xf32>
    %c1_52 = arith.constant 1 : index
    %c0_53 = arith.constant 0 : index
    %92 = vector.load %arg8[%c1_52, %c0_53] : memref<2x7168xf32, #tpu.memory_space<vmem>>, vector<1x512xf32>
    %93 = vector.shape_cast %92 : vector<1x512xf32> to vector<512xf32>
    %94 = vector.shape_cast %91 : vector<512xf32> to vector<1x512xf32>
    tpu.vector_store %arg8[%c1_52, %c0_53], %94 {strides = array<i32>} : memref<2x7168xf32, #tpu.memory_space<vmem>>, vector<1x512xf32>,
    %c17 = arith.constant 17 : index
    %c0_54 = arith.constant 0 : index
    %95 = vector.load %arg7[%c17, %c0_54] : memref<30x512xf32, #tpu.memory_space<vmem>>, vector<1x512xf32>
    %96 = vector.shape_cast %95 : vector<1x512xf32> to vector<512xf32>
    %c1_55 = arith.constant 1 : index
    %c512_56 = arith.constant 512 : index
    %97 = vector.load %arg8[%c1_55, %c512_56] : memref<2x7168xf32, #tpu.memory_space<vmem>>, vector<1x512xf32>
    %98 = vector.shape_cast %97 : vector<1x512xf32> to vector<512xf32>
    %99 = vector.shape_cast %96 : vector<512xf32> to vector<1x512xf32>
    tpu.vector_store %arg8[%c1_55, %c512_56], %99 {strides = array<i32>} : memref<2x7168xf32, #tpu.memory_space<vmem>>, vector<1x512xf32>,
    %c18 = arith.constant 18 : index
    %c0_57 = arith.constant 0 : index
    %100 = vector.load %arg7[%c18, %c0_57] : memref<30x512xf32, #tpu.memory_space<vmem>>, vector<1x512xf32>
    %101 = vector.shape_cast %100 : vector<1x512xf32> to vector<512xf32>
    %c1_58 = arith.constant 1 : index
    %c1024_59 = arith.constant 1024 : index
    %102 = vector.load %arg8[%c1_58, %c1024_59] : memref<2x7168xf32, #tpu.memory_space<vmem>>, vector<1x512xf32>
    %103 = vector.shape_cast %102 : vector<1x512xf32> to vector<512xf32>
    %104 = vector.shape_cast %101 : vector<512xf32> to vector<1x512xf32>
    tpu.vector_store %arg8[%c1_58, %c1024_59], %104 {strides = array<i32>} : memref<2x7168xf32, #tpu.memory_space<vmem>>, vector<1x512xf32>,
    %c19 = arith.constant 19 : index
    %c0_60 = arith.constant 0 : index
    %105 = vector.load %arg7[%c19, %c0_60] : memref<30x512xf32, #tpu.memory_space<vmem>>, vector<1x512xf32>
    %106 = vector.shape_cast %105 : vector<1x512xf32> to vector<512xf32>
    %c1_61 = arith.constant 1 : index
    %c1536_62 = arith.constant 1536 : index
    %107 = vector.load %arg8[%c1_61, %c1536_62] : memref<2x7168xf32, #tpu.memory_space<vmem>>, vector<1x512xf32>
    %108 = vector.shape_cast %107 : vector<1x512xf32> to vector<512xf32>
    %109 = vector.shape_cast %106 : vector<512xf32> to vector<1x512xf32>
    tpu.vector_store %arg8[%c1_61, %c1536_62], %109 {strides = array<i32>} : memref<2x7168xf32, #tpu.memory_space<vmem>>, vector<1x512xf32>,
    %c20 = arith.constant 20 : index
    %c0_63 = arith.constant 0 : index
    %110 = vector.load %arg7[%c20, %c0_63] : memref<30x512xf32, #tpu.memory_space<vmem>>, vector<1x512xf32>
    %111 = vector.shape_cast %110 : vector<1x512xf32> to vector<512xf32>
    %c1_64 = arith.constant 1 : index
    %c2048_65 = arith.constant 2048 : index
    %112 = vector.load %arg8[%c1_64, %c2048_65] : memref<2x7168xf32, #tpu.memory_space<vmem>>, vector<1x512xf32>
    %113 = vector.shape_cast %112 : vector<1x512xf32> to vector<512xf32>
    %114 = vector.shape_cast %111 : vector<512xf32> to vector<1x512xf32>
    tpu.vector_store %arg8[%c1_64, %c2048_65], %114 {strides = array<i32>} : memref<2x7168xf32, #tpu.memory_space<vmem>>, vector<1x512xf32>,
    %c21 = arith.constant 21 : index
    %c0_66 = arith.constant 0 : index
    %115 = vector.load %arg7[%c21, %c0_66] : memref<30x512xf32, #tpu.memory_space<vmem>>, vector<1x512xf32>
    %116 = vector.shape_cast %115 : vector<1x512xf32> to vector<512xf32>
    %c1_67 = arith.constant 1 : index
    %c2560_68 = arith.constant 2560 : index
    %117 = vector.load %arg8[%c1_67, %c2560_68] : memref<2x7168xf32, #tpu.memory_space<vmem>>, vector<1x512xf32>
    %118 = vector.shape_cast %117 : vector<1x512xf32> to vector<512xf32>
    %119 = vector.shape_cast %116 : vector<512xf32> to vector<1x512xf32>
    tpu.vector_store %arg8[%c1_67, %c2560_68], %119 {strides = array<i32>} : memref<2x7168xf32, #tpu.memory_space<vmem>>, vector<1x512xf32>,
    %c22 = arith.constant 22 : index
    %c0_69 = arith.constant 0 : index
    %120 = vector.load %arg7[%c22, %c0_69] : memref<30x512xf32, #tpu.memory_space<vmem>>, vector<1x512xf32>
    %121 = vector.shape_cast %120 : vector<1x512xf32> to vector<512xf32>
    %c1_70 = arith.constant 1 : index
    %c3072_71 = arith.constant 3072 : index
    %122 = vector.load %arg8[%c1_70, %c3072_71] : memref<2x7168xf32, #tpu.memory_space<vmem>>, vector<1x512xf32>
    %123 = vector.shape_cast %122 : vector<1x512xf32> to vector<512xf32>
    %124 = vector.shape_cast %121 : vector<512xf32> to vector<1x512xf32>
    tpu.vector_store %arg8[%c1_70, %c3072_71], %124 {strides = array<i32>} : memref<2x7168xf32, #tpu.memory_space<vmem>>, vector<1x512xf32>,
    %c23 = arith.constant 23 : index
    %c0_72 = arith.constant 0 : index
    %125 = vector.load %arg7[%c23, %c0_72] : memref<30x512xf32, #tpu.memory_space<vmem>>, vector<1x512xf32>
    %126 = vector.shape_cast %125 : vector<1x512xf32> to vector<512xf32>
    %c1_73 = arith.constant 1 : index
    %c3584_74 = arith.constant 3584 : index
    %127 = vector.load %arg8[%c1_73, %c3584_74] : memref<2x7168xf32, #tpu.memory_space<vmem>>, vector<1x512xf32>
    %128 = vector.shape_cast %127 : vector<1x512xf32> to vector<512xf32>
    %129 = vector.shape_cast %126 : vector<512xf32> to vector<1x512xf32>
    tpu.vector_store %arg8[%c1_73, %c3584_74], %129 {strides = array<i32>} : memref<2x7168xf32, #tpu.memory_space<vmem>>, vector<1x512xf32>,
    %c24 = arith.constant 24 : index
    %c0_75 = arith.constant 0 : index
    %130 = vector.load %arg7[%c24, %c0_75] : memref<30x512xf32, #tpu.memory_space<vmem>>, vector<1x512xf32>
    %131 = vector.shape_cast %130 : vector<1x512xf32> to vector<512xf32>
    %c1_76 = arith.constant 1 : index
    %c4096_77 = arith.constant 4096 : index
    %132 = vector.load %arg8[%c1_76, %c4096_77] : memref<2x7168xf32, #tpu.memory_space<vmem>>, vector<1x512xf32>
    %133 = vector.shape_cast %132 : vector<1x512xf32> to vector<512xf32>
    %134 = vector.shape_cast %131 : vector<512xf32> to vector<1x512xf32>
    tpu.vector_store %arg8[%c1_76, %c4096_77], %134 {strides = array<i32>} : memref<2x7168xf32, #tpu.memory_space<vmem>>, vector<1x512xf32>,
    %c25 = arith.constant 25 : index
    %c0_78 = arith.constant 0 : index
    %135 = vector.load %arg7[%c25, %c0_78] : memref<30x512xf32, #tpu.memory_space<vmem>>, vector<1x512xf32>
    %136 = vector.shape_cast %135 : vector<1x512xf32> to vector<512xf32>
    %c1_79 = arith.constant 1 : index
    %c4608_80 = arith.constant 4608 : index
    %137 = vector.load %arg8[%c1_79, %c4608_80] : memref<2x7168xf32, #tpu.memory_space<vmem>>, vector<1x512xf32>
    %138 = vector.shape_cast %137 : vector<1x512xf32> to vector<512xf32>
    %139 = vector.shape_cast %136 : vector<512xf32> to vector<1x512xf32>
    tpu.vector_store %arg8[%c1_79, %c4608_80], %139 {strides = array<i32>} : memref<2x7168xf32, #tpu.memory_space<vmem>>, vector<1x512xf32>,
    %c26 = arith.constant 26 : index
    %c0_81 = arith.constant 0 : index
    %140 = vector.load %arg7[%c26, %c0_81] : memref<30x512xf32, #tpu.memory_space<vmem>>, vector<1x512xf32>
    %141 = vector.shape_cast %140 : vector<1x512xf32> to vector<512xf32>
    %c1_82 = arith.constant 1 : index
    %c5120_83 = arith.constant 5120 : index
    %142 = vector.load %arg8[%c1_82, %c5120_83] : memref<2x7168xf32, #tpu.memory_space<vmem>>, vector<1x512xf32>
    %143 = vector.shape_cast %142 : vector<1x512xf32> to vector<512xf32>
    %144 = vector.shape_cast %141 : vector<512xf32> to vector<1x512xf32>
    tpu.vector_store %arg8[%c1_82, %c5120_83], %144 {strides = array<i32>} : memref<2x7168xf32, #tpu.memory_space<vmem>>, vector<1x512xf32>,
    %c27 = arith.constant 27 : index
    %c0_84 = arith.constant 0 : index
    %145 = vector.load %arg7[%c27, %c0_84] : memref<30x512xf32, #tpu.memory_space<vmem>>, vector<1x512xf32>
    %146 = vector.shape_cast %145 : vector<1x512xf32> to vector<512xf32>
    %c1_85 = arith.constant 1 : index
    %c5632_86 = arith.constant 5632 : index
    %147 = vector.load %arg8[%c1_85, %c5632_86] : memref<2x7168xf32, #tpu.memory_space<vmem>>, vector<1x512xf32>
    %148 = vector.shape_cast %147 : vector<1x512xf32> to vector<512xf32>
    %149 = vector.shape_cast %146 : vector<512xf32> to vector<1x512xf32>
    tpu.vector_store %arg8[%c1_85, %c5632_86], %149 {strides = array<i32>} : memref<2x7168xf32, #tpu.memory_space<vmem>>, vector<1x512xf32>,
    %c28 = arith.constant 28 : index
    %c0_87 = arith.constant 0 : index
    %150 = vector.load %arg7[%c28, %c0_87] : memref<30x512xf32, #tpu.memory_space<vmem>>, vector<1x512xf32>
    %151 = vector.shape_cast %150 : vector<1x512xf32> to vector<512xf32>
    %c1_88 = arith.constant 1 : index
    %c6144_89 = arith.constant 6144 : index
    %152 = vector.load %arg8[%c1_88, %c6144_89] : memref<2x7168xf32, #tpu.memory_space<vmem>>, vector<1x512xf32>
    %153 = vector.shape_cast %152 : vector<1x512xf32> to vector<512xf32>
    %154 = vector.shape_cast %151 : vector<512xf32> to vector<1x512xf32>
    tpu.vector_store %arg8[%c1_88, %c6144_89], %154 {strides = array<i32>} : memref<2x7168xf32, #tpu.memory_space<vmem>>, vector<1x512xf32>,
    %c29 = arith.constant 29 : index
    %c0_90 = arith.constant 0 : index
    %155 = vector.load %arg7[%c29, %c0_90] : memref<30x512xf32, #tpu.memory_space<vmem>>, vector<1x512xf32>
    %156 = vector.shape_cast %155 : vector<1x512xf32> to vector<512xf32>
    %c1_91 = arith.constant 1 : index
    %c6656_92 = arith.constant 6656 : index
    %157 = vector.load %arg8[%c1_91, %c6656_92] : memref<2x7168xf32, #tpu.memory_space<vmem>>, vector<1x512xf32>
    %158 = vector.shape_cast %157 : vector<1x512xf32> to vector<512xf32>
    %159 = vector.shape_cast %156 : vector<512xf32> to vector<1x512xf32>
    tpu.vector_store %arg8[%c1_91, %c6656_92], %159 {strides = array<i32>} : memref<2x7168xf32, #tpu.memory_space<vmem>>, vector<1x512xf32>,
    %c0_93 = arith.constant 0 : index
    %c0_94 = arith.constant 0 : index
    %160 = vector.load %arg8[%c0_93, %c0_94] : memref<2x7168xf32, #tpu.memory_space<vmem>>, vector<2x7168xf32>
    %161 = arith.truncf %160 : vector<2x7168xf32> to vector<2x7168xbf16>
    %c0_95 = arith.constant 0 : index
    %c0_96 = arith.constant 0 : index
    %162 = vector.load %arg4[%c0_95, %c0_96] : memref<10x7168xbf16, #tpu.memory_space<vmem>>, vector<10x7168xbf16>
    %cst_97 = arith.constant dense<0.000000e+00> : vector<2x10xf32>
    %163 = tpu.matmul %161, %162, %cst_97 {dimension_numbers = #tpu.dot_dimension_numbers<[1], [1], [0], [0], [0, 0, 1, 0], [], []>} : vector<2x7168xbf16>, vector<10x7168xbf16>, vector<2x10xf32> -> vector<2x10xf32>
    %c0_98 = arith.constant 0 : index
    %c0_99 = arith.constant 0 : index
    %164 = vector.load %arg5[%c0_98, %c0_99] : memref<1x10xf32, #tpu.memory_space<vmem>>, vector<1x10xf32>
    %165 = vector.broadcast %164 : vector<1x10xf32> to vector<2x10xf32>
    %166 = arith.addf %163, %165 : vector<2x10xf32>
    %cst_100 = arith.constant dense<0xFF800000> : vector<2xf32>
    %167 = vector.multi_reduction <maximumf>, %166, %cst_100 [1] : vector<2x10xf32> to vector<2xf32>
    %168 = vector.shape_cast %167 : vector<2xf32> to vector<2x1xf32>
    %169 = vector.broadcast %168 : vector<2x1xf32> to vector<2x10xf32>
    %170 = arith.subf %166, %169 : vector<2x10xf32>
    %171 = math.exp %170 : vector<2x10xf32>
    %cst_101 = arith.constant dense<0.000000e+00> : vector<2xf32>
    %172 = vector.multi_reduction <add>, %171, %cst_101 [1] : vector<2x10xf32> to vector<2xf32>
    %173 = vector.shape_cast %172 : vector<2xf32> to vector<2x1xf32>
    %174 = math.log %173 : vector<2x1xf32>
    %175 = vector.broadcast %174 : vector<2x1xf32> to vector<2x10xf32>
    %176 = arith.subf %170, %175 : vector<2x10xf32>
    %c0_102 = arith.constant 0 : index
    %c0_103 = arith.constant 0 : index
    %177 = vector.load %arg6[%c0_102, %c0_103] : memref<2x10xf32, #tpu.memory_space<vmem>>, vector<2x10xf32>
    tpu.vector_store %arg6[%c0_102, %c0_103], %176 {strides = array<i32>} : memref<2x10xf32, #tpu.memory_space<vmem>>, vector<2x10xf32>,
    return
  }
  func.func @transform_0(%arg0: i32) -> (i32, i32) {
    %c0_i32 = arith.constant 0 : i32
    %c0_i32_0 = arith.constant 0 : i32
    return %arg0, %c0_i32 : i32, i32
  }
  func.func @transform_1(%arg0: i32) -> (i32, i32, i32) {
    %c0_i32 = arith.constant 0 : i32
    %c0_i32_0 = arith.constant 0 : i32
    %c0_i32_1 = arith.constant 0 : i32
    %c0_i32_2 = arith.constant 0 : i32
    return %c0_i32, %c0_i32_0, %c0_i32_1 : i32, i32, i32
  }
  func.func @transform_2(%arg0: i32) -> (i32, i32) {
    %c0_i32 = arith.constant 0 : i32
    %c0_i32_0 = arith.constant 0 : i32
    %c0_i32_1 = arith.constant 0 : i32
    return %c0_i32, %c0_i32_0 : i32, i32
  }
  func.func @transform_3(%arg0: i32) -> (i32, i32) {
    %c0_i32 = arith.constant 0 : i32
    %c0_i32_0 = arith.constant 0 : i32
    %c0_i32_1 = arith.constant 0 : i32
    return %c0_i32, %c0_i32_0 : i32, i32
  }
  func.func @transform_4(%arg0: i32) -> (i32, i32) {
    %c0_i32 = arith.constant 0 : i32
    %c0_i32_0 = arith.constant 0 : i32
    %c0_i32_1 = arith.constant 0 : i32
    return %c0_i32, %c0_i32_0 : i32, i32
  }
  func.func @transform_5(%arg0: i32) -> (i32, i32) {
    %c0_i32 = arith.constant 0 : i32
    %c0_i32_0 = arith.constant 0 : i32
    return %arg0, %c0_i32 : i32, i32
  }
}

</mosaic_0001>

<bundles_post_ra>
// kernel: cnn_forward.1
= control target key start
LH: loop header
LB: loop body
LE: loop exit
PB: predicated region body
PF: predicated region fallthrough
CT: control target
= control target key end

     0   :  { %10 = vsyncpa [#allocation5], 0  ;;  %s3471_s0 = inlined_call_operand.vmem [shape: bf16[32,64], index: 0, kind: input, shape index: {}]   ;;  %s3472_s1 = inlined_call_operand.hbm [shape: bf16[3,64,512], index: 1, kind: input, shape index: {}]   ;;  %s3473_s2 = inlined_call_operand.vmem [shape: f32[1,512], index: 2, kind: input, shape index: {}]   ;;  %s3474_s3 = inlined_call_operand.vmem [shape: bf16[10,7168], index: 3, kind: input, shape index: {}]   ;;  %s3475_s4 = inlined_call_operand.vmem [shape: f32[1,10], index: 4, kind: input, shape index: {}]   ;;  %s3476_s5 = inlined_call_operand.hbm [shape: f32[2,10], index: 5, kind: output, shape index: {}]  }
   0x1   :  { %11 = vsyncpa [#allocation6], 0  ;;  %s18_s20 = sshll.u32 %s3472_s1, 4  ;;  %s2731_s21 = smov [#allocation4]   ;;  %s19_s20 = int_to_ptr.hbm [resolvable:$true] %s18_s20 }
   0x2   :  { %s20_s22 = sshll.u32 %s2731_s21, 4  ;;  %s2732_s23 = smov 256   ;;  %s21_s22 = int_to_ptr.vmem [resolvable:$true] %s20_s22 }
   0x3   :  { %s2733_s24 = smov 16  }
   0x4   :  { %26 = dma.hbm_to_vmem [thread:$0]  %s19_s20, 6144, %s21_s22, [#allocation5], %s2732_s23, %s2732_s23, %s2733_s24  }
   0x5   :  { %2726 = dma.done.wait [#allocation5], 6144  }
   0x6   :  { %2727 = vsyncadd [#allocation5], 4294961152  ;;  %v2164_v0 = vld [vmem:[#allocation4 + $0xe0] sm:$0xf]  ;;  %v2584_v1 = vld [vmem:[#allocation4 + $0xec] sm:$0xf0] }
   0x7   :  { %v2582_v2 = vld [vmem:[#allocation4 + $0xe4] sm:$0xf]  ;;  %v2165_v3 = vor.u32 %v2584_v1, %v2164_v0  ;;  %v2166_v4 = vld [vmem:[#allocation4 + $0xf0] sm:$0xf0]  ;;  %v2172_v5 = vld [vmem:[#allocation4 + $0xe8] sm:$0xf] }
   0x8   :  { %v2585_v6 = vld [vmem:[#allocation4 + $0xf4] sm:$0xf0]  ;;  %v2169_v7 = vor.u32 %v2582_v2, %v2166_v4  ;;  %v2583_v9 = vld [vmem:[#allocation4 + $0xec] sm:$0xf]  ;;  %v2174_v10 = vld [vmem:[#allocation4 + $0xf8] sm:$0xf0] }
   0x9   :  { %v2173_v8 = vor.u32 %v2585_v6, %v2172_v5  ;;  %v2148_v11 = vld [vmem:[#allocation4 + $0xc0] sm:$0xf]  ;;  %194 = vmatpush.bf16.msra.mxu0 %v2165_v3  ;;  %v2177_v12 = vor.u32 %v2583_v9, %v2174_v10  ;;  %v2580_v13 = vld [vmem:[#allocation4 + $0xcc] sm:$0xf0]  ;;  %v2578_v14 = vld [vmem:[#allocation4 + $0xc4] sm:$0xf] }
   0xa   :  { %v2150_v15 = vld [vmem:[#allocation4 + $0xd0] sm:$0xf0]  ;;  %213 = vmatpush.bf16.msra.mxu1 %v2169_v7  ;;  %v2149_v16 = vor.u32 %v2580_v13, %v2148_v11  ;;  %v2156_v18 = vld [vmem:[#allocation4 + $0xc8] sm:$0xf]  ;;  %v2581_v19 = vld [vmem:[#allocation4 + $0xd4] sm:$0xf0] }
   0xb   :  { %232 = vmatpush.bf16.msra.mxu2 %v2173_v8  ;;  %v2153_v17 = vor.u32 %v2578_v14, %v2150_v15  ;;  %v2579_v20 = vld [vmem:[#allocation4 + $0xcc] sm:$0xf]  ;;  %251 = vmatpush.bf16.msra.mxu3 %v2177_v12  ;;  %v2157_v21 = vor.u32 %v2581_v19, %v2156_v18  ;;  %v2158_v22 = vld [vmem:[#allocation4 + $0xd8] sm:$0xf0]  ;;  %v2132_v23 = vld [vmem:[#allocation4 + $0xa0] sm:$0xf] }
   0xc   :  { %v2576_v24 = vld [vmem:[#allocation4 + $0xac] sm:$0xf0]  ;;  %v2161_v25 = vor.u32 %v2579_v20, %v2158_v22  ;;  %v2574_v26 = vld [vmem:[#allocation4 + $0xa4] sm:$0xf]  ;;  %v2134_v27 = vld [vmem:[#allocation4 + $0xb0] sm:$0xf0] }
   0xd   :  { %v2140_v28 = vld [vmem:[#allocation4 + $0xa8] sm:$0xf]  ;;  %195 = vmatpush.bf16.msra.mxu0 %v2149_v16  ;;  %v2133_v29 = vor.u32 %v2576_v24, %v2132_v23  ;;  %v2577_v30 = vld [vmem:[#allocation4 + $0xb4] sm:$0xf0]  ;;  %v2575_v31 = vld [vmem:[#allocation4 + $0xac] sm:$0xf]  ;;  %v2137_v33 = vor.u32 %v2574_v26, %v2134_v27 }
   0xe   :  { %v2142_v32 = vld [vmem:[#allocation4 + $0xb8] sm:$0xf0]  ;;  %214 = vmatpush.bf16.msra.mxu1 %v2153_v17  ;;  %v2141_v34 = vor.u32 %v2577_v30, %v2140_v28  ;;  %v2116_v35 = vld [vmem:[#allocation4 + $0x80] sm:$0xf]  ;;  %v2572_v36 = vld [vmem:[#allocation4 + $0x8c] sm:$0xf0] }
   0xf   :  { %233 = vmatpush.bf16.msra.mxu2 %v2157_v21  ;;  %v2570_v37 = vld [vmem:[#allocation4 + $0x84] sm:$0xf]  ;;  %252 = vmatpush.bf16.msra.mxu3 %v2161_v25  ;;  %v2145_v38 = vor.u32 %v2575_v31, %v2142_v32  ;;  %v2118_v39 = vld [vmem:[#allocation4 + $0x90] sm:$0xf0]  ;;  %v2124_v40 = vld [vmem:[#allocation4 + $0x88] sm:$0xf]  ;;  %v2117_v45 = vor.u32 %v2572_v36, %v2116_v35 }
  0x10   :  { %v2573_v41 = vld [vmem:[#allocation4 + $0x94] sm:$0xf0]  ;;  %v2571_v42 = vld [vmem:[#allocation4 + $0x8c] sm:$0xf]  ;;  %v2126_v43 = vld [vmem:[#allocation4 + $0x98] sm:$0xf0]  ;;  %v2121_v51 = vor.u32 %v2570_v37, %v2118_v39 }
  0x11   :  { %v2771_v44 = vld [vmem:[%s3471_s0] sm:$0xff]   ;;  %196 = vmatpush.bf16.msra.mxu0 %v2133_v29  ;;  %v2776_v46 = vld [vmem:[%s3471_s0 + $0x8] sm:$0xff]   ;;  %v2125_v52 = vor.u32 %v2573_v41, %v2124_v40  ;;  %v2569_v53 = vld [vmem:[#allocation4 + $0x74] sm:$0xf0]  ;;  %v2129_v56 = vor.u32 %v2571_v42, %v2126_v43  ;;  %vm87_vm0 = vsmask.f32 7424 }
  0x12   :  { %v2781_v47 = vld [vmem:[%s3471_s0 + $0x8] sm:$0xf]   ;;  %v89_v48 = vshrl.u32 %v2771_v44, 16  ;;  %v91_v49 = vshll.u32 %v2771_v44, 16  ;;  %v2244_v50 = vld [vmem:[#allocation4 + $0x68] sm:$0xf]  ;;  %215 = vmatpush.bf16.msra.mxu1 %v2137_v33 }
  0x13   :  { %234 = vmatpush.bf16.msra.mxu2 %v2141_v34  ;;  %v2567_v54 = vld [vmem:[#allocation4 + $0x6c] sm:$0xf]  ;;  %v2246_v55 = vld [vmem:[#allocation4 + $0x78] sm:$0xf0]  ;;  %253 = vmatpush.bf16.msra.mxu3 %v2145_v38  ;;  %v2245_v58 = vor.u32 %v2569_v53, %v2244_v50  ;;  %v2236_v59 = vld [vmem:[#allocation4 + $0x60] sm:$0xf] }
  0x14   :  { %v93_v57 = vrot.slane %v91_v49, 1  ;;  %v2568_v60 = vld [vmem:[#allocation4 + $0x6c] sm:$0xf0]  ;;  %v2249_v61 = vor.u32 %v2567_v54, %v2246_v55  ;;  %v2566_v63 = vld [vmem:[#allocation4 + $0x64] sm:$0xf]  ;;  %v96_v6 = vshll.u32 %v2776_v46, 16 }
  0x15   :  { %v2237_v62 = vor.u32 %v2568_v60, %v2236_v59  ;;  %v2238_v0 = vld [vmem:[#allocation4 + $0x70] sm:$0xf0]  ;;  %197 = vmatpush.bf16.msra.mxu0 %v2117_v45  ;;  %v2228_v2 = vld [vmem:[#allocation4 + $0x48] sm:$0xf]  ;;  %v2565_v3 = vld [vmem:[#allocation4 + $0x54] sm:$0xf0] }
  0x16   :  { %v2241_v1 = vor.u32 %v2566_v63, %v2238_v0  ;;  %v2563_v4 = vld [vmem:[#allocation4 + $0x4c] sm:$0xf]  ;;  %216 = vmatpush.bf16.msra.mxu1 %v2121_v51  ;;  %v94_v5 = vor.u32 %v93_v57, %v89_v48  ;;  %v2230_v7 = vld [vmem:[#allocation4 + $0x58] sm:$0xf0]  ;;  %v2220_v8 = vld [vmem:[#allocation4 + $0x40] sm:$0xf]  ;;  %v2229_v13 = vor.u32 %v2565_v3, %v2228_v2 }
  0x17   :  { %235 = vmatpush.bf16.msra.mxu2 %v2125_v52  ;;  %254 = vmatpush.bf16.msra.mxu3 %v2129_v56  ;;  %v2564_v9 = vld [vmem:[#allocation4 + $0x4c] sm:$0xf0]  ;;  %v2562_v10 = vld [vmem:[#allocation4 + $0x44] sm:$0xf]  ;;  %v2222_v11 = vld [vmem:[#allocation4 + $0x50] sm:$0xf0]  ;;  %v2233_v14 = vor.u32 %v2563_v4, %v2230_v7 }
  0x18   :  { %v2786_v12 = vrot.slane %v96_v6, 1  ;;  %vm183_vm1 = vcmask 523264   ;;  %v2212_v15 = vld [vmem:[#allocation4 + $0x28] sm:$0xf]  ;;  %v2561_v16 = vld [vmem:[#allocation4 + $0x34] sm:$0xf0]  ;;  %v2221_v18 = vor.u32 %v2564_v9, %v2220_v8  ;;  %v2225_v19 = vor.u32 %v2562_v10, %v2222_v11 }
  0x19   :  { %358 = vmatpush.bf16.msrb.mxu0 %v2237_v62  ;;  %v2559_v20 = vld [vmem:[#allocation4 + $0x2c] sm:$0xf]  ;;  %v2214_v21 = vld [vmem:[#allocation4 + $0x38] sm:$0xf0]  ;;  %v2204_v22 = vld [vmem:[#allocation4 + $0x20] sm:$0xf]  ;;  %v2213_v27 = vor.u32 %v2561_v16, %v2212_v15 }
  0x1a   :  { %377 = vmatpush.bf16.msrb.mxu1 %v2241_v1  ;;  %v99_v17 = vsel %vm87_vm0, %v94_v5, %v2786_v12  ;;  %v2560_v23 = vld [vmem:[#allocation4 + $0x2c] sm:$0xf0]  ;;  %v2558_v24 = vld [vmem:[#allocation4 + $0x24] sm:$0xf]  ;;  %v2206_v25 = vld [vmem:[#allocation4 + $0x30] sm:$0xf0]  ;;  %v2217_v28 = vor.u32 %v2559_v20, %v2214_v21 }
  0x1b   :  { %396 = vmatpush.bf16.msrb.mxu2 %v2245_v58  ;;  %415 = vmatpush.bf16.msrb.mxu3 %v2249_v61  ;;  %v2196_v26 = vld [vmem:[#allocation4 + $0x8] sm:$0xf]  ;;  %v2557_v29 = vld [vmem:[#allocation4 + $0x14] sm:$0xf0]  ;;  %v2555_v30 = vld [vmem:[#allocation4 + $0xc] sm:$0xf]  ;;  %v2205_v32 = vor.u32 %v2560_v23, %v2204_v22  ;;  %v2209_v33 = vor.u32 %v2558_v24, %v2206_v25 }
  0x1c   :  { %2178 = vmatmul.msk.bf16.vlgmr.msra.gmra.mxu0 %vm183_vm1, %v99_v17  ;;  %2180 = vmatmul.msk.bf16.vlgmr.msra.gmra.mxu1 %vm183_vm1, %v99_v17  ;;  %v2198_v31 = vld [vmem:[#allocation4 + $0x18] sm:$0xf0]  ;;  %v2188_v34 = vld [vmem:[#allocation4] sm:$0xf]  ;;  %v2556_v35 = vld [vmem:[#allocation4 + $0xc] sm:$0xf0]  ;;  %v2197_v43 = vor.u32 %v2557_v29, %v2196_v26 }
  0x1d   :  { %2182 = vmatmul.msk.bf16.vlgmr.msra.gmra.mxu2 %vm183_vm1, %v99_v17  ;;  %2184 = vmatmul.msk.bf16.vlgmr.msra.gmra.mxu3 %vm183_vm1, %v99_v17  ;;  %v2554_v36 = vld [vmem:[#allocation4 + $0x4] sm:$0xf]  ;;  %v2190_v37 = vld [vmem:[#allocation4 + $0x10] sm:$0xf0]  ;;  %v2316_v38 = vld [vmem:[#allocation4 + $0x168] sm:$0xf]  ;;  %v2201_v45 = vor.u32 %v2555_v30, %v2198_v31  ;;  %v2189_v51 = vor.u32 %v2556_v35, %v2188_v34 }
  0x1e   :  { %359 = vmatpush.bf16.msrb.mxu0 %v2221_v18  ;;  %378 = vmatpush.bf16.msrb.mxu1 %v2225_v19  ;;  %v2601_v39 = vld [vmem:[#allocation4 + $0x174] sm:$0xf0]  ;;  %v2599_v40 = vld [vmem:[#allocation4 + $0x16c] sm:$0xf]  ;;  %v2318_v41 = vld [vmem:[#allocation4 + $0x178] sm:$0xf0]  ;;  %v2193_v52 = vor.u32 %v2554_v36, %v2190_v37 }
  0x1f   :  { %397 = vmatpush.bf16.msrb.mxu2 %v2229_v13  ;;  %416 = vmatpush.bf16.msrb.mxu3 %v2233_v14  ;;  %v2308_v42 = vld [vmem:[#allocation4 + $0x160] sm:$0xf]  ;;  %v2600_v48 = vld [vmem:[#allocation4 + $0x16c] sm:$0xf0]  ;;  %v2598_v49 = vld [vmem:[#allocation4 + $0x164] sm:$0xf]  ;;  %v2317_v54 = vor.u32 %v2601_v39, %v2316_v38  ;;  %v2321_v55 = vor.u32 %v2599_v40, %v2318_v41 }
  0x20   :  { %v2310_v50 = vld [vmem:[#allocation4 + $0x170] sm:$0xf0]  ;;  %v100_v53 = vshrl.u32 %v2776_v46, 16  ;;  %v2309_v56 = vor.u32 %v2600_v48, %v2308_v42  ;;  %v2300_v58 = vld [vmem:[#allocation4 + $0x148] sm:$0xf]  ;;  %v453_v35 = vrot.slane %v2776_v46, 1 }
  0x21   :  { %v2313_v57 = vor.u32 %v2598_v49, %v2310_v50  ;;  %v2597_v59 = vld [vmem:[#allocation4 + $0x154] sm:$0xf0]  ;;  %v2595_v60 = vld [vmem:[#allocation4 + $0x14c] sm:$0xf]  ;;  %v2302_v61 = vld [vmem:[#allocation4 + $0x158] sm:$0xf0] }
  0x22   :  { %360 = vmatpush.bf16.msrb.mxu0 %v2205_v32  ;;  %379 = vmatpush.bf16.msrb.mxu1 %v2209_v33  ;;  %v2292_v62 = vld [vmem:[#allocation4 + $0x140] sm:$0xf]  ;;  %v102_v63 = vor.u32 %v100_v53, %v2786_v12  ;;  %v2596_v0 = vld [vmem:[#allocation4 + $0x14c] sm:$0xf0]  ;;  %v2594_v1 = vld [vmem:[#allocation4 + $0x144] sm:$0xf]  ;;  %v2301_v3 = vor.u32 %v2597_v59, %v2300_v58  ;;  %v2305_v4 = vor.u32 %v2595_v60, %v2302_v61 }
  0x23   :  { %398 = vmatpush.bf16.msrb.mxu2 %v2213_v27  ;;  %417 = vmatpush.bf16.msrb.mxu3 %v2217_v28  ;;  %v2294_v2 = vld [vmem:[#allocation4 + $0x150] sm:$0xf0]  ;;  %v2293_v5 = vor.u32 %v2596_v0, %v2292_v62  ;;  %v2284_v7 = vld [vmem:[#allocation4 + $0x128] sm:$0xf]  ;;  %v2593_v8 = vld [vmem:[#allocation4 + $0x134] sm:$0xf0] }
  0x24   :  { %v2297_v6 = vor.u32 %v2594_v1, %v2294_v2  ;;  %v2591_v9 = vld [vmem:[#allocation4 + $0x12c] sm:$0xf]  ;;  %v2285_v10 = vor.u32 %v2593_v8, %v2284_v7  ;;  %v2286_v11 = vld [vmem:[#allocation4 + $0x138] sm:$0xf0]  ;;  %v2276_v12 = vld [vmem:[#allocation4 + $0x120] sm:$0xf] }
  0x25   :  { %v2592_v13 = vld [vmem:[#allocation4 + $0x12c] sm:$0xf0]  ;;  %v2289_v14 = vor.u32 %v2591_v9, %v2286_v11  ;;  %v2590_v16 = vld [vmem:[#allocation4 + $0x124] sm:$0xf]  ;;  %v2278_v17 = vld [vmem:[#allocation4 + $0x130] sm:$0xf0] }
  0x26   :  { %361 = vmatpush.bf16.msrb.mxu0 %v2189_v51  ;;  %380 = vmatpush.bf16.msrb.mxu1 %v2193_v52  ;;  %v2277_v15 = vor.u32 %v2592_v13, %v2276_v12  ;;  %v2268_v18 = vld [vmem:[#allocation4 + $0x108] sm:$0xf]  ;;  %v2281_v19 = vor.u32 %v2590_v16, %v2278_v17  ;;  %v2589_v20 = vld [vmem:[#allocation4 + $0x114] sm:$0xf0]  ;;  %v2587_v21 = vld [vmem:[#allocation4 + $0x10c] sm:$0xf] }
  0x27   :  { %399 = vmatpush.bf16.msrb.mxu2 %v2197_v43  ;;  %418 = vmatpush.bf16.msrb.mxu3 %v2201_v45  ;;  %v2270_v22 = vld [vmem:[#allocation4 + $0x118] sm:$0xf0]  ;;  %v2260_v23 = vld [vmem:[#allocation4 + $0x100] sm:$0xf]  ;;  %v2588_v24 = vld [vmem:[#allocation4 + $0x10c] sm:$0xf0]  ;;  %v2269_v26 = vor.u32 %v2589_v20, %v2268_v18 }
  0x28   :  { %v2586_v25 = vld [vmem:[#allocation4 + $0x104] sm:$0xf]  ;;  %v2273_v27 = vor.u32 %v2587_v21, %v2270_v22  ;;  %v2262_v28 = vld [vmem:[#allocation4 + $0x110] sm:$0xf0]  ;;  %v2261_v29 = vor.u32 %v2588_v24, %v2260_v23  ;;  %v2662_v33 = vld [vmem:[%s3471_s0] sm:$0xf0] }
  0x29   :  { %v2265_v30 = vor.u32 %v2586_v25, %v2262_v28  ;;  %v2730_v31 = vld [vmem:[%s3471_s0 + $0x8] sm:$0x70]  ;;  %vm451_vm2 = vcmask 1046528   ;;  %vm2083_vm4 = vcmask 74752   ;;  %s2104_s14 = sshll.u32 %s3476_s5, 4  ;;  %s2105_s14 = int_to_ptr.hbm [resolvable:$true] %s2104_s14 }
  0x2a   :  { %545 = vmatpush.bf16.msra.mxu0 %v2309_v56  ;;  %564 = vmatpush.bf16.msra.mxu1 %v2313_v57  ;;  %v2677_v32 = vor.u32 %v2730_v31, %v2781_v47 }
  0x2b   :  { %583 = vmatpush.bf16.msra.mxu2 %v2317_v54  ;;  %602 = vmatpush.bf16.msra.mxu3 %v2321_v55 }
  0x2c   :  { %2179 = vmatmul.msk.bf16.gmra.mxu0 %vm183_vm1, %v102_v63  ;;  %2181 = vmatmul.msk.bf16.gmra.mxu1 %vm183_vm1, %v102_v63 }
  0x2d   :  { %2183 = vmatmul.msk.bf16.gmra.mxu2 %vm183_vm1, %v102_v63  ;;  %2185 = vmatmul.msk.bf16.gmra.mxu3 %vm183_vm1, %v102_v63 }
  0x2e   :  { %546 = vmatpush.bf16.msra.mxu0 %v2293_v5  ;;  %565 = vmatpush.bf16.msra.mxu1 %v2297_v6  ;;  %v38_v5 = vld [vmem:[%s3473_s2] sm:$0xf] }
  0x2f   :  { %584 = vmatpush.bf16.msra.mxu2 %v2301_v3  ;;  %603 = vmatpush.bf16.msra.mxu3 %v2305_v4  ;;  %v2868_v11 = vperm.slane %v38_v5, 1  ;;  %v2872_v22 = vperm.slane %v38_v5, 2  ;;  %v2874_v23 = vperm.slane %v38_v5, 3 }
  0x32   :  { %547 = vmatpush.bf16.msra.mxu0 %v2277_v15  ;;  %566 = vmatpush.bf16.msra.mxu1 %v2281_v19 }
  0x33   :  { %585 = vmatpush.bf16.msra.mxu2 %v2285_v10  ;;  %604 = vmatpush.bf16.msra.mxu3 %v2289_v14  ;;  %v2866_v10 = vperm.slane %v38_v5, 0 }
  0x36   :  { %548 = vmatpush.bf16.msra.mxu0 %v2261_v29  ;;  %567 = vmatpush.bf16.msra.mxu1 %v2265_v30 }
  0x37   :  { %586 = vmatpush.bf16.msra.mxu2 %v2269_v26  ;;  %605 = vmatpush.bf16.msra.mxu3 %v2273_v27 }
  0x3c   :  { %2250 = vmatmul.msk.bf16.vlgmr.msrb.gmra.mxu0 %vm183_vm1, %v2771_v44  ;;  %2252 = vmatmul.msk.bf16.vlgmr.msrb.gmra.mxu1 %vm183_vm1, %v2771_v44 }
  0x3d   :  { %2254 = vmatmul.msk.bf16.vlgmr.msrb.gmra.mxu2 %vm183_vm1, %v2771_v44  ;;  %2256 = vmatmul.msk.bf16.vlgmr.msrb.gmra.mxu3 %vm183_vm1, %v2771_v44  ;;  %v2663_v44 = vld [vmem:[%s3471_s0] sm:$0xe] }
  0x3e   :  { %v2664_v34 = vor.u32 %v2663_v44, %v2662_v33 }
  0x40   :  { %v452_v47 = vrot.slane %v2664_v34, 1 }
  0x42   :  { %v454_v36 = vsel %vm451_vm2, %v452_v47, %v453_v35 }
  0x4c   :  { %2251 = vmatmul.msk.bf16.gmra.mxu0 %vm183_vm1, %v2677_v32  ;;  %2253 = vmatmul.msk.bf16.gmra.mxu1 %vm183_vm1, %v2677_v32 }
  0x4d   :  { %2255 = vmatmul.msk.bf16.gmra.mxu2 %vm183_vm1, %v2677_v32  ;;  %2257 = vmatmul.msk.bf16.gmra.mxu3 %vm183_vm1, %v2677_v32 }
  0x5c   :  { %2322 = vmatmul.msk.bf16.vlgmr.msra.gmra.mxu0 %vm183_vm1, %v454_v36  ;;  %2324 = vmatmul.msk.bf16.vlgmr.msra.gmra.mxu1 %vm183_vm1, %v454_v36 }
  0x5d   :  { %2326 = vmatmul.msk.bf16.vlgmr.msra.gmra.mxu2 %vm183_vm1, %v454_v36  ;;  %2328 = vmatmul.msk.bf16.vlgmr.msra.gmra.mxu3 %vm183_vm1, %v454_v36 }
  0x6c   :  { %2323 = vmatmul.msk.bf16.gmra.mxu0 %vm183_vm1, %v453_v35  ;;  %2325 = vmatmul.msk.bf16.gmra.mxu1 %vm183_vm1, %v453_v35 }
  0x6d   :  { %2327 = vmatmul.msk.bf16.gmra.mxu2 %vm183_vm1, %v453_v35  ;;  %2329 = vmatmul.msk.bf16.gmra.mxu3 %vm183_vm1, %v453_v35 }
  0x99   :  { %v199_v46 = vpop.f32.mrf.mxu0  ;;  %v218_v37 = vpop.f32.mrf.mxu1 }
  0xa0   :  { %v237_v38 = vpop.f32.mrf.mxu2  ;;  %v256_v39 = vpop.f32.mrf.mxu3 }
  0xa1   :  { %v201_v40 = vpop.f32.mrf.mxu0  ;;  %v220_v41 = vpop.f32.mrf.mxu1 }
  0xa8   :  { %v2831_v42 = vpop.f32.mrf.mxu2  ;;  %v2833_v43 = vpop.f32.mrf.mxu3 }
  0xa9   :  { %v2835_v45 = vpop.f32.mrf.mxu0  ;;  %v2837_v48 = vpop.f32.mrf.mxu1 }
  0xb0   :  { %v2839_v49 = vpop.f32.mrf.mxu2  ;;  %v2841_v50 = vpop.f32.mrf.mxu3 }
  0xb1   :  { %v2843_v51 = vpop.f32.mrf.mxu0  ;;  %v2845_v52 = vpop.f32.mrf.mxu1 }
  0xb8   :  { %v2847_v53 = vpop.f32.mrf.mxu2  ;;  %v2849_v54 = vpop.f32.mrf.mxu3 }
  0xb9   :  { %v363_v55 = vpop.f32.mrf.mxu0  ;;  %v382_v56 = vpop.f32.mrf.mxu1 }
  0xba   :  { %v364_v6 = vadd.f32 %v363_v55, %v199_v46  ;;  %v383_v7 = vadd.f32 %v382_v56, %v218_v37  ;;  %v691_v56 = vlaneseq }
  0xbc   :  { %vm2886_vm3 = vcmp.lt.s32.totalorder %v691_v56, 512  ;;  %v2334_v56 = vld [vmem:[%s3474_s3 + $0xe0] sm:$0x10] }
  0xc0   :  { %v401_v57 = vpop.f32.mrf.mxu2  ;;  %v420_v58 = vpop.f32.mrf.mxu3 }
  0xc1   :  { %v365_v59 = vpop.f32.mrf.mxu0  ;;  %v384_v60 = vpop.f32.mrf.mxu1  ;;  %v402_v20 = vadd.f32 %v401_v57, %v237_v38  ;;  %v421_v21 = vadd.f32 %v420_v58, %v256_v39 }
  0xc2   :  { %v366_v24 = vadd.f32 %v365_v59, %v201_v40  ;;  %v385_v25 = vadd.f32 %v384_v60, %v220_v41 }
  0xc8   :  { %v403_v61 = vpop.f32.mrf.mxu2  ;;  %v422_v62 = vpop.f32.mrf.mxu3 }
  0xc9   :  { %v368_v63 = vpop.f32.mrf.mxu0  ;;  %v387_v0 = vpop.f32.mrf.mxu1  ;;  %v404_v39 = vadd.f32 %v403_v61, %v2831_v42  ;;  %v423_v40 = vadd.f32 %v422_v62, %v2833_v43 }
  0xca   :  { %v388_v42 = vadd.f32 %v387_v0, %v2837_v48 }
  0xd0   :  { %v2851_v1 = vpop.f32.mrf.mxu2  ;;  %v2853_v2 = vpop.f32.mrf.mxu3 }
  0xd1   :  { %v2855_v3 = vpop.f32.mrf.mxu0  ;;  %v2857_v4 = vpop.f32.mrf.mxu1 }
  0xd8   :  { %v2862_v8 = vpop.f32.mrf.mxu2  ;;  %v2864_v9 = vpop.f32.mrf.mxu3 }
  0xd9   :  { %v550_v12 = vpop.f32.mrf.mxu0  ;;  %v569_v13 = vpop.f32.mrf.mxu1 }
  0xda   :  { %v617_v14 = vadd.f32 %v550_v12, %v364_v6  ;;  %v618_v15 = vadd.f32 %v569_v13, %v383_v7  ;;  %v369_v7 = vadd.f32 %v368_v63, %v2835_v45  ;;  %v407_v13 = vadd.f32 %v2851_v1, %v2839_v49 }
  0xdb   :  { %v371_v45 = vadd.f32 %v2855_v3, %v2843_v51 }
  0xdc   :  { %v642_v16 = vadd.f32 %v2866_v10, %v617_v14  ;;  %v643_v17 = vadd.f32 %v2868_v11, %v618_v15  ;;  %v426_v14 = vadd.f32 %v2853_v2, %v2841_v50 }
  0xde   :  { %v658_v18 = vmax.f32 %v642_v16, 0.0  ;;  %v659_v19 = vmax.f32 %v643_v17, 0.0 }
  0xe0   :  { %674 = vst [vmem:[#allocation2] sm:$0xff] %v658_v18  ;;  %v588_v26 = vpop.f32.mrf.mxu2  ;;  %v607_v27 = vpop.f32.mrf.mxu3  ;;  %v390_v18 = vadd.f32 %v2857_v4, %v2845_v52 }
  0xe1   :  { %675 = vst [vmem:[#allocation2 + $0x8] sm:$0xff] %v659_v19  ;;  %v619_v28 = vadd.f32 %v588_v26, %v402_v20  ;;  %v620_v29 = vadd.f32 %v607_v27, %v421_v21  ;;  %v552_v30 = vpop.f32.mrf.mxu0  ;;  %v571_v31 = vpop.f32.mrf.mxu1 }
  0xe2   :  { %v621_v32 = vadd.f32 %v552_v30, %v366_v24  ;;  %v622_v33 = vadd.f32 %v571_v31, %v385_v25  ;;  %v409_v30 = vadd.f32 %v2862_v8, %v2847_v53  ;;  %v428_v31 = vadd.f32 %v2864_v9, %v2849_v54  ;;  %v2332_v53 = vld [vmem:[%s3474_s3] sm:$0xf] }
  0xe3   :  { %v644_v44 = vadd.f32 %v2872_v22, %v619_v28  ;;  %v645_v34 = vadd.f32 %v2874_v23, %v620_v29 }
  0xe4   :  { %v646_v35 = vadd.f32 %v2866_v10, %v621_v32  ;;  %v647_v47 = vadd.f32 %v2868_v11, %v622_v33  ;;  %v2340_v33 = vld [vmem:[%s3474_s3 + $0x8] sm:$0xf] }
  0xe5   :  { %v660_v36 = vmax.f32 %v644_v44, 0.0  ;;  %v661_v46 = vmax.f32 %v645_v34, 0.0 }
  0xe6   :  { %v662_v37 = vmax.f32 %v646_v35, 0.0  ;;  %v663_v38 = vmax.f32 %v647_v47, 0.0  ;;  %v2630_v47 = vld [vmem:[%s3474_s3 + $0xdc] sm:$0x10] }
  0xe7   :  { %676 = vst [vmem:[#allocation2 + $0x10] sm:$0xff] %v660_v36 }
  0xe8   :  { %677 = vst [vmem:[#allocation2 + $0x18] sm:$0xff] %v661_v46  ;;  %v590_v41 = vpop.f32.mrf.mxu2  ;;  %v609_v55 = vpop.f32.mrf.mxu3 }
  0xe9   :  { %678 = vst [vmem:[#allocation2 + $0x20] sm:$0xff] %v662_v37  ;;  %v623_v57 = vadd.f32 %v590_v41, %v404_v39  ;;  %v624_v58 = vadd.f32 %v609_v55, %v423_v40  ;;  %v555_v59 = vpop.f32.mrf.mxu0  ;;  %v574_v60 = vpop.f32.mrf.mxu1  ;;  %v2342_v39 = vld [vmem:[%s3474_s3 + $0xe8] sm:$0x10]  ;;  %v2602_v40 = vld [vmem:[%s3474_s3 + $0x4] sm:$0xf] }
  0xea   :  { %679 = vst [vmem:[#allocation2 + $0x28] sm:$0xff] %v663_v38  ;;  %v625_v12 = vadd.f32 %v555_v59, %v369_v7  ;;  %v626_v17 = vadd.f32 %v574_v60, %v388_v42  ;;  %v2333_v38 = vor.u32 %v2630_v47, %v2332_v53  ;;  %v2337_v59 = vor.u32 %v2602_v40, %v2334_v56 }
  0xeb   :  { %v648_v5 = vadd.f32 %v2872_v22, %v623_v57  ;;  %v649_v6 = vadd.f32 %v2874_v23, %v624_v58 }
  0xec   :  { %v650_v3 = vadd.f32 %v2866_v10, %v625_v12  ;;  %v651_v52 = vadd.f32 %v2868_v11, %v626_v17  ;;  %1362 = vmatpush.bf16.xpose.msrb.mxu0 %v2333_v38  ;;  %1375 = vmatpush.bf16.xpose.msrb.mxu1 %v2337_v59 }
  0xed   :  { %v664_v61 = vmax.f32 %v648_v5, 0.0  ;;  %v665_v62 = vmax.f32 %v649_v6, 0.0 }
  0xee   :  { %v666_v28 = vmax.f32 %v650_v3, 0.0  ;;  %v667_v32 = vmax.f32 %v651_v52, 0.0  ;;  %v2604_v3 = vld [vmem:[%s3474_s3 + $0x14] sm:$0xf] }
  0xef   :  { %v690_v15 = vld [vmem:[#allocation2] ss:$8 sm:$0xf]  ;;  %v697_v16 = vld [vmem:[#allocation2 + $0x1] ss:$8 sm:$0xf] }
  0xf0   :  { %695 = vst.msk [vmem:[#allocation3] ss:$2 sm:$0xf] %vm2886_vm3, %v690_v15  ;;  %v701_v48 = vld [vmem:[#allocation2 + $0x2] ss:$8 sm:$0xf]  ;;  %v593_v63 = vpop.f32.mrf.mxu2  ;;  %v612_v0 = vpop.f32.mrf.mxu3 }
  0xf1   :  { %699 = vst.msk [vmem:[#allocation3 + $0x8] ss:$2 sm:$0xf] %vm2886_vm3, %v697_v16  ;;  %v705_v49 = vld [vmem:[#allocation2 + $0x3] ss:$8 sm:$0xf]  ;;  %v627_v50 = vadd.f32 %v593_v63, %v407_v13  ;;  %v628_v1 = vadd.f32 %v612_v0, %v426_v14  ;;  %v557_v2 = vpop.f32.mrf.mxu0  ;;  %v576_v19 = vpop.f32.mrf.mxu1 }
  0xf2   :  { %703 = vst.msk [vmem:[#allocation3 + $0x10] ss:$2 sm:$0xf] %vm2886_vm3, %v701_v48  ;;  %v709_v51 = vld [vmem:[#allocation2 + $0x4] ss:$8 sm:$0xf]  ;;  %v629_v20 = vadd.f32 %v557_v2, %v371_v45  ;;  %v630_v4 = vadd.f32 %v576_v19, %v390_v18 }
  0xf3   :  { %707 = vst.msk [vmem:[#allocation3 + $0x18] ss:$2 sm:$0xf] %vm2886_vm3, %v705_v49  ;;  %v713_v21 = vld [vmem:[#allocation2 + $0x5] ss:$8 sm:$0xf]  ;;  %v652_v25 = vadd.f32 %v2872_v22, %v627_v50  ;;  %v653_v27 = vadd.f32 %v2874_v23, %v628_v1 }
  0xf4   :  { %711 = vst.msk [vmem:[#allocation3 + $0x20] ss:$2 sm:$0xf] %vm2886_vm3, %v709_v51  ;;  %v717_v24 = vld [vmem:[#allocation2 + $0x6] ss:$8 sm:$0xf]  ;;  %v654_v29 = vadd.f32 %v2866_v10, %v629_v20  ;;  %v655_v44 = vadd.f32 %v2868_v11, %v630_v4 }
  0xf5   :  { %715 = vst.msk [vmem:[#allocation3 + $0x28] ss:$2 sm:$0xf] %vm2886_vm3, %v713_v21  ;;  %v721_v26 = vld [vmem:[#allocation2 + $0x7] ss:$8 sm:$0xf] }
  0xf6   :  { %719 = vst.msk [vmem:[#allocation3 + $0x30] ss:$2 sm:$0xf] %vm2886_vm3, %v717_v24  ;;  %v668_v34 = vmax.f32 %v652_v25, 0.0  ;;  %v2631_v10 = vld [vmem:[%s3474_s3 + $0xe4] sm:$0x10] }
  0xf7   :  { %723 = vst.msk [vmem:[#allocation3 + $0x38] ss:$2 sm:$0xf] %vm2886_vm3, %v721_v26  ;;  %v669_v9 = vmax.f32 %v653_v27, 0.0  ;;  %v2341_v35 = vor.u32 %v2631_v10, %v2340_v33  ;;  %v2603_v11 = vld [vmem:[%s3474_s3 + $0xc] sm:$0xf] }
  0xf8   :  { %680 = vst [vmem:[#allocation2 + $0x30] sm:$0xff] %v664_v61  ;;  %v595_v54 = vpop.f32.mrf.mxu2  ;;  %v614_v8 = vpop.f32.mrf.mxu3  ;;  %v670_v37 = vmax.f32 %v654_v29, 0.0  ;;  %v671_v41 = vmax.f32 %v655_v44, 0.0  ;;  %v2345_v55 = vor.u32 %v2603_v11, %v2342_v39  ;;  %v2356_v48 = vld [vmem:[%s3474_s3 + $0x18] sm:$0xf] }
  0xf9   :  { %681 = vst [vmem:[#allocation2 + $0x38] sm:$0xff] %v665_v62  ;;  %v631_v36 = vadd.f32 %v595_v54, %v409_v30  ;;  %v632_v46 = vadd.f32 %v614_v8, %v428_v31  ;;  %1388 = vmatpush.bf16.xpose.msrb.mxu2 %v2341_v35  ;;  %v2633_v0 = vld [vmem:[%s3474_s3 + $0xf4] sm:$0x10]  ;;  %v2348_v49 = vld [vmem:[%s3474_s3 + $0x10] sm:$0xf] }
  0xfa   :  { %682 = vst [vmem:[#allocation2 + $0x40] sm:$0xff] %v666_v28  ;;  %1401 = vmatpush.bf16.xpose.msrb.mxu3 %v2345_v55  ;;  %v2357_v18 = vor.u32 %v2633_v0, %v2356_v48  ;;  %v2632_v50 = vld [vmem:[%s3474_s3 + $0xec] sm:$0x10]  ;;  %v2605_v2 = vld [vmem:[%s3474_s3 + $0x1c] sm:$0xf] }
  0xfb   :  { %683 = vst [vmem:[#allocation2 + $0x48] sm:$0xff] %v667_v32  ;;  %v656_v57 = vadd.f32 %v2872_v22, %v631_v36  ;;  %v657_v58 = vadd.f32 %v2874_v23, %v632_v46  ;;  %v2349_v1 = vor.u32 %v2632_v50, %v2348_v49  ;;  %v2358_v51 = vld [vmem:[%s3474_s3 + $0xf8] sm:$0x10]  ;;  %v2350_v21 = vld [vmem:[%s3474_s3 + $0xf0] sm:$0x10] }
  0xfc   :  { %684 = vst [vmem:[#allocation2 + $0x50] sm:$0xff] %v668_v34  ;;  %v2361_v20 = vor.u32 %v2605_v2, %v2358_v51  ;;  %v2353_v52 = vor.u32 %v2604_v3, %v2350_v21  ;;  %v2364_v25 = vld [vmem:[%s3474_s3 + $0x20] sm:$0xf]  ;;  %v2372_v29 = vld [vmem:[%s3474_s3 + $0x28] sm:$0xf] }
  0xfd   :  { %685 = vst [vmem:[#allocation2 + $0x58] sm:$0xff] %v669_v9  ;;  %v672_v60 = vmax.f32 %v656_v57, 0.0  ;;  %v673_v5 = vmax.f32 %v657_v58, 0.0  ;;  %1414 = vmatpush.bf16.xpose.msra.mxu0 %v2349_v1  ;;  %v2634_v26 = vld [vmem:[%s3474_s3 + $0xfc] sm:$0x10] }
  0xfe   :  { %686 = vst [vmem:[#allocation2 + $0x60] sm:$0x3f] %v670_v37  ;;  %1427 = vmatpush.bf16.xpose.msra.mxu1 %v2353_v52  ;;  %v2635_v30 = vld [vmem:[%s3474_s3 + $0x104] sm:$0x10]  ;;  %v2607_v31 = vld [vmem:[%s3474_s3 + $0x2c] sm:$0xf]  ;;  %v2365_v8 = vor.u32 %v2634_v26, %v2364_v25 }
  0xff   :  { %687 = vst [vmem:[#allocation2 + $0x68] sm:$0x3f] %v671_v41  ;;  %v2374_v32 = vld [vmem:[%s3474_s3 + $0x108] sm:$0x10]  ;;  %v2606_v44 = vld [vmem:[%s3474_s3 + $0x24] sm:$0xf]  ;;  %v2373_v46 = vor.u32 %v2635_v30, %v2372_v29 }
 0x100   :  { %v725_v6 = vld [vmem:[#allocation2 + $0x20] ss:$8 sm:$0xf]  ;;  %v729_v7 = vld [vmem:[#allocation2 + $0x21] ss:$8 sm:$0xf]  ;;  %v2377_v37 = vor.u32 %v2607_v31, %v2374_v32 }
 0x101   :  { %727 = vst.msk [vmem:[#allocation3 + $0x40] ss:$2 sm:$0xf] %vm2886_vm3, %v725_v6  ;;  %v733_v42 = vld [vmem:[#allocation2 + $0x22] ss:$8 sm:$0xf]  ;;  %1440 = vmatpush.bf16.xpose.msra.mxu2 %v2357_v18 }
 0x102   :  { %731 = vst.msk [vmem:[#allocation3 + $0x48] ss:$2 sm:$0xf] %vm2886_vm3, %v729_v7  ;;  %v737_v22 = vld [vmem:[#allocation2 + $0x23] ss:$8 sm:$0xf]  ;;  %1453 = vmatpush.bf16.xpose.msra.mxu3 %v2361_v20 }
 0x103   :  { %735 = vst.msk [vmem:[#allocation3 + $0x50] ss:$2 sm:$0xf] %vm2886_vm3, %v733_v42  ;;  %v741_v23 = vld [vmem:[#allocation2 + $0x24] ss:$8 sm:$0xf] }
 0x104   :  { %739 = vst.msk [vmem:[#allocation3 + $0x58] ss:$2 sm:$0xf] %vm2886_vm3, %v737_v22  ;;  %v745_v61 = vld [vmem:[#allocation2 + $0x25] ss:$8 sm:$0xf] }
 0x105   :  { %743 = vst.msk [vmem:[#allocation3 + $0x60] ss:$2 sm:$0xf] %vm2886_vm3, %v741_v23  ;;  %v749_v62 = vld [vmem:[#allocation2 + $0x40] ss:$8 sm:$0xf] }
 0x106   :  { %747 = vst.msk [vmem:[#allocation3 + $0x68] ss:$2 sm:$0xf] %vm2886_vm3, %v745_v61  ;;  %v753_v12 = vld [vmem:[#allocation2 + $0x41] ss:$8 sm:$0xf] }
 0x107   :  { %751 = vst.msk [vmem:[#allocation3 + $0x1] ss:$2 sm:$0xf] %vm2886_vm3, %v749_v62  ;;  %v757_v13 = vld [vmem:[#allocation2 + $0x42] ss:$8 sm:$0xf] }
 0x108   :  { %755 = vst.msk [vmem:[#allocation3 + $0x9] ss:$2 sm:$0xf] %vm2886_vm3, %v753_v12  ;;  %v761_v14 = vld [vmem:[#allocation2 + $0x43] ss:$8 sm:$0xf] }
 0x109   :  { %759 = vst.msk [vmem:[#allocation3 + $0x11] ss:$2 sm:$0xf] %vm2886_vm3, %v757_v13  ;;  %v765_v15 = vld [vmem:[#allocation2 + $0x44] ss:$8 sm:$0xf] }
 0x10a   :  { %763 = vst.msk [vmem:[#allocation3 + $0x19] ss:$2 sm:$0xf] %vm2886_vm3, %v761_v14  ;;  %v769_v16 = vld [vmem:[#allocation2 + $0x45] ss:$8 sm:$0xf] }
 0x10b   :  { %767 = vst.msk [vmem:[#allocation3 + $0x21] ss:$2 sm:$0xf] %vm2886_vm3, %v765_v15  ;;  %v773_v17 = vld [vmem:[#allocation2 + $0x46] ss:$8 sm:$0xf] }
 0x10c   :  { %771 = vst.msk [vmem:[#allocation3 + $0x29] ss:$2 sm:$0xf] %vm2886_vm3, %v769_v16  ;;  %v777_v45 = vld [vmem:[#allocation2 + $0x47] ss:$8 sm:$0xf] }
 0x10d   :  { %775 = vst.msk [vmem:[#allocation3 + $0x31] ss:$2 sm:$0xf] %vm2886_vm3, %v773_v17  ;;  %v2366_v34 = vld [vmem:[%s3474_s3 + $0x100] sm:$0x10] }
 0x10e   :  { %779 = vst.msk [vmem:[#allocation3 + $0x39] ss:$2 sm:$0xf] %vm2886_vm3, %v777_v45  ;;  %v804_v63 = vld [vmem:[#allocation3] sm:$0xff]  ;;  %v2369_v40 = vor.u32 %v2606_v44, %v2366_v34  ;;  %v2380_v7 = vld [vmem:[%s3474_s3 + $0x30] sm:$0xf] }
 0x10f   :  { %688 = vst [vmem:[#allocation2 + $0x70] sm:$0x3f] %v672_v60  ;;  %v805_v19 = vld [vmem:[#allocation3 + $0x8] sm:$0xff]  ;;  %v2388_v22 = vld [vmem:[%s3474_s3 + $0x38] sm:$0xf] }
 0x110   :  { %689 = vst [vmem:[#allocation2 + $0x78] sm:$0x3f] %v673_v5  ;;  %v806_v54 = vld [vmem:[#allocation3 + $0x10] sm:$0xff]  ;;  %v2636_v61 = vld [vmem:[%s3474_s3 + $0x10c] sm:$0x10] }
 0x111   :  { %832 = vst [vmem:[#allocation1] ss:$4 sm:$0xff] %v804_v63  ;;  %v807_v56 = vld [vmem:[#allocation3 + $0x18] sm:$0xff]  ;;  %v2637_v23 = vld [vmem:[%s3474_s3 + $0x114] sm:$0x10]  ;;  %v2381_v17 = vor.u32 %v2636_v61, %v2380_v7 }
 0x112   :  { %834 = vst [vmem:[#allocation1 + $0x20] ss:$4 sm:$0xff] %v805_v19  ;;  %v808_v58 = vld [vmem:[#allocation3 + $0x20] sm:$0xff]  ;;  %v2609_v62 = vld [vmem:[%s3474_s3 + $0x3c] sm:$0xf]  ;;  %v2389_v18 = vor.u32 %v2637_v23, %v2388_v22 }
 0x113   :  { %v809_v42 = vld [vmem:[#allocation3 + $0x28] sm:$0xff]  ;;  %v2390_v12 = vld [vmem:[%s3474_s3 + $0x118] sm:$0x10]  ;;  %v2404_v29 = vld [vmem:[%s3474_s3 + $0x48] sm:$0xf] }
 0x114   :  { %v2608_v45 = vld [vmem:[%s3474_s3 + $0x34] sm:$0xf]  ;;  %v2393_v49 = vor.u32 %v2609_v62, %v2390_v12  ;;  %v810_v21 = vld [vmem:[#allocation3 + $0x30] sm:$0xff]  ;;  %v2639_v30 = vld [vmem:[%s3474_s3 + $0x124] sm:$0x10] }
 0x115   :  { %v2382_v48 = vld [vmem:[%s3474_s3 + $0x110] sm:$0x10]  ;;  %v811_v52 = vld [vmem:[#allocation3 + $0x38] sm:$0xff]  ;;  %v2611_v32 = vld [vmem:[%s3474_s3 + $0x4c] sm:$0xf] }
 0x116   :  { %v2385_v2 = vor.u32 %v2608_v45, %v2382_v48  ;;  %v2638_v31 = vld [vmem:[%s3474_s3 + $0x11c] sm:$0x10]  ;;  %v2412_v23 = vld [vmem:[%s3474_s3 + $0x50] sm:$0xf]  ;;  %v2420_v62 = vld [vmem:[%s3474_s3 + $0x58] sm:$0xf] }
 0x117   :  { %v781_v4 = vld [vmem:[#allocation2 + $0x60] ss:$8 sm:$0xf]  ;;  %v785_v24 = vld [vmem:[#allocation2 + $0x61] ss:$8 sm:$0xf] }
 0x118   :  { %783 = vst.msk [vmem:[#allocation3 + $0x41] ss:$2 sm:$0xf] %vm2886_vm3, %v781_v4  ;;  %v789_v27 = vld [vmem:[#allocation2 + $0x62] ss:$8 sm:$0xf] }
 0x119   :  { %787 = vst.msk [vmem:[#allocation3 + $0x49] ss:$2 sm:$0xf] %vm2886_vm3, %v785_v24  ;;  %v793_v28 = vld [vmem:[#allocation2 + $0x63] ss:$8 sm:$0xf] }
 0x11a   :  { %791 = vst.msk [vmem:[#allocation3 + $0x51] ss:$2 sm:$0xf] %vm2886_vm3, %v789_v27  ;;  %v797_v33 = vld [vmem:[#allocation2 + $0x64] ss:$8 sm:$0xf] }
 0x11b   :  { %795 = vst.msk [vmem:[#allocation3 + $0x59] ss:$2 sm:$0xf] %vm2886_vm3, %v793_v28  ;;  %v801_v10 = vld [vmem:[#allocation2 + $0x65] ss:$8 sm:$0xf] }
 0x11c   :  { %799 = vst.msk [vmem:[#allocation3 + $0x61] ss:$2 sm:$0xf] %vm2886_vm3, %v797_v33  ;;  %v835_v53 = vld.sshfl [vmem:[#allocation1] sm:$0xff pattern:$0x73625140] }
 0x11d   :  { %803 = vst.msk [vmem:[#allocation3 + $0x69] ss:$2 sm:$0xf] %vm2886_vm3, %v801_v10  ;;  %v959_v9 = vpack.c.bf16 %v835_v53, %v835_v53  ;;  %v836_v35 = vld.sshfl [vmem:[#allocation1 + $0x8] sm:$0xff pattern:$0x73625140] }
 0x11e   :  { %v960_v47 = vpack.c.bf16 %v836_v35, %v836_v35  ;;  %v837_v11 = vld.sshfl [vmem:[#allocation1 + $0x10] sm:$0xff pattern:$0x73625140]  ;;  %v838_v36 = vld.sshfl [vmem:[#allocation1 + $0x18] sm:$0xff pattern:$0x73625140] }
 0x11f   :  { %1363 = vmatmul.bf16.vlgmr.msrb.gmra.mxu0 %v959_v9  ;;  %v961_v38 = vpack.c.bf16 %v837_v11, %v837_v11  ;;  %843 = vst [vmem:[#allocation1] ss:$4 sm:$0xff] %v806_v54  ;;  %v962_v39 = vpack.c.bf16 %v838_v36, %v838_v36  ;;  %v839_v41 = vld.sshfl [vmem:[#allocation1 + $0x20] sm:$0xff pattern:$0x73625140]  ;;  %v812_v28 = vld [vmem:[#allocation3 + $0x40] sm:$0xff] }
 0x120   :  { %1376 = vmatmul.bf16.vlgmr.msrb.gmra.mxu1 %v960_v47  ;;  %v840_v55 = vld.sshfl [vmem:[#allocation1 + $0x28] sm:$0xff pattern:$0x73625140]  ;;  %1466 = vmatpush.bf16.xpose.msrb.mxu0 %v2365_v8  ;;  %v841_v43 = vld.sshfl [vmem:[#allocation1 + $0x30] sm:$0xff pattern:$0x73625140]  ;;  %v963_v63 = vpack.c.bf16 %v839_v41, %v839_v41 }
 0x121   :  { %1389 = vmatmul.bf16.vlgmr.msrb.gmra.mxu2 %v961_v38  ;;  %1402 = vmatmul.bf16.vlgmr.msrb.gmra.mxu3 %v962_v39  ;;  %v842_v57 = vld.sshfl [vmem:[#allocation1 + $0x38] sm:$0xff pattern:$0x73625140]  ;;  %v964_v0 = vpack.c.bf16 %v840_v55, %v840_v55  ;;  %v965_v50 = vpack.c.bf16 %v841_v43, %v841_v43  ;;  %v2396_v27 = vld [vmem:[%s3474_s3 + $0x40] sm:$0xf]  ;;  %v813_v54 = vld [vmem:[#allocation3 + $0x48] sm:$0xff] }
 0x122   :  { %1492 = vmatpush.bf16.xpose.msrb.mxu2 %v2373_v46  ;;  %1505 = vmatpush.bf16.xpose.msrb.mxu3 %v2377_v37  ;;  %844 = vst [vmem:[#allocation1 + $0x20] ss:$4 sm:$0xff] %v807_v56  ;;  %v966_v1 = vpack.c.bf16 %v842_v57, %v842_v57  ;;  %v2406_v33 = vld [vmem:[%s3474_s3 + $0x128] sm:$0x10]  ;;  %v2397_v8 = vor.u32 %v2638_v31, %v2396_v27  ;;  %v2610_v9 = vld [vmem:[%s3474_s3 + $0x44] sm:$0xf] }
 0x123   :  { %1479 = vmatpush.bf16.xpose.msrb.mxu1 %v2369_v40  ;;  %v2398_v35 = vld [vmem:[%s3474_s3 + $0x120] sm:$0x10]  ;;  %v2405_v37 = vor.u32 %v2639_v30, %v2404_v29  ;;  %v2409_v38 = vor.u32 %v2611_v32, %v2406_v33  ;;  %v814_v56 = vld [vmem:[#allocation3 + $0x50] sm:$0xff]  ;;  %v2640_v61 = vld [vmem:[%s3474_s3 + $0x12c] sm:$0x10] }
 0x124   :  { %v2401_v43 = vor.u32 %v2610_v9, %v2398_v35  ;;  %v2641_v12 = vld [vmem:[%s3474_s3 + $0x134] sm:$0x10]  ;;  %v2422_v45 = vld [vmem:[%s3474_s3 + $0x138] sm:$0x10]  ;;  %v816_v48 = vld [vmem:[#allocation3 + $0x60] sm:$0xff] }
 0x125   :  { %v817_v32 = vld [vmem:[#allocation3 + $0x68] sm:$0xff]  ;;  %v2643_v9 = vld [vmem:[%s3474_s3 + $0x144] sm:$0x10]  ;;  %v2615_v35 = vld [vmem:[%s3474_s3 + $0x6c] sm:$0xf] }
 0x126   :  { %v3038_v59 = vld.sshfl [vmem:[#allocation1] sm:$0xff pattern:$0x73625140]  ;;  %v3040_v60 = vld.sshfl [vmem:[#allocation1 + $0x8] sm:$0xff pattern:$0x73625140] }
 0x127   :  { %v3042_v5 = vld.sshfl [vmem:[#allocation1 + $0x10] sm:$0xff pattern:$0x73625140]  ;;  %v3044_v6 = vld.sshfl [vmem:[#allocation1 + $0x18] sm:$0xff pattern:$0x73625140]  ;;  %v967_v47 = vpack.c.bf16 %v3038_v59, %v3038_v59  ;;  %v968_v46 = vpack.c.bf16 %v3040_v60, %v3040_v60 }
 0x128   :  { %853 = vst [vmem:[#allocation1] ss:$4 sm:$0xff] %v808_v58  ;;  %v969_v41 = vpack.c.bf16 %v3042_v5, %v3042_v5  ;;  %v970_v55 = vpack.c.bf16 %v3044_v6, %v3044_v6 }
 0x129   :  { %v3064_v13 = vld.sshfl [vmem:[#allocation1 + $0x20] sm:$0xff pattern:$0x73625140]  ;;  %v3066_v14 = vld.sshfl [vmem:[#allocation1 + $0x28] sm:$0xff pattern:$0x73625140] }
 0x12a   :  { %v3068_v15 = vld.sshfl [vmem:[#allocation1 + $0x30] sm:$0xff pattern:$0x73625140]  ;;  %v3070_v16 = vld.sshfl [vmem:[#allocation1 + $0x38] sm:$0xff pattern:$0x73625140] }
 0x12b   :  { %854 = vst [vmem:[#allocation1 + $0x20] ss:$4 sm:$0xff] %v809_v42  ;;  %v815_v42 = vld [vmem:[#allocation3 + $0x58] sm:$0xff]  ;;  %v973_v29 = vpack.c.bf16 %v3068_v15, %v3068_v15 }
 0x12f   :  { %1415 = vmatmul.bf16.vlgmr.msra.gmra.mxu0 %v963_v63  ;;  %v3078_v19 = vld.sshfl [vmem:[#allocation1] sm:$0xff pattern:$0x73625140]  ;;  %v3080_v51 = vld.sshfl [vmem:[#allocation1 + $0x8] sm:$0xff pattern:$0x73625140]  ;;  %v2413_v63 = vor.u32 %v2640_v61, %v2412_v23 }
 0x130   :  { %1428 = vmatmul.bf16.vlgmr.msra.gmra.mxu1 %v964_v0  ;;  %1518 = vmatpush.bf16.xpose.msra.mxu0 %v2381_v17  ;;  %v3082_v3 = vld.sshfl [vmem:[#allocation1 + $0x10] sm:$0xff pattern:$0x73625140]  ;;  %v3084_v20 = vld.sshfl [vmem:[#allocation1 + $0x18] sm:$0xff pattern:$0x73625140] }
 0x131   :  { %1441 = vmatmul.bf16.vlgmr.msra.gmra.mxu2 %v965_v50  ;;  %1454 = vmatmul.bf16.vlgmr.msra.gmra.mxu3 %v966_v1  ;;  %863 = vst [vmem:[#allocation1] ss:$4 sm:$0xff] %v810_v21  ;;  %v2613_v17 = vld [vmem:[%s3474_s3 + $0x5c] sm:$0xf]  ;;  %v2612_v0 = vld [vmem:[%s3474_s3 + $0x54] sm:$0xf]  ;;  %v2421_v21 = vor.u32 %v2641_v12, %v2420_v62  ;;  %v978_v23 = vpack.c.bf16 %v3084_v20, %v3084_v20 }
 0x132   :  { %1544 = vmatpush.bf16.xpose.msra.mxu2 %v2389_v18  ;;  %1557 = vmatpush.bf16.xpose.msra.mxu3 %v2393_v49  ;;  %v3086_v4 = vld.sshfl [vmem:[#allocation1 + $0x20] sm:$0xff pattern:$0x73625140]  ;;  %v3088_v24 = vld.sshfl [vmem:[#allocation1 + $0x28] sm:$0xff pattern:$0x73625140]  ;;  %v971_v49 = vpack.c.bf16 %v3064_v13, %v3064_v13  ;;  %v974_v13 = vpack.c.bf16 %v3070_v16, %v3070_v16 }
 0x133   :  { %1531 = vmatpush.bf16.xpose.msra.mxu1 %v2385_v2  ;;  %v3090_v25 = vld.sshfl [vmem:[#allocation1 + $0x30] sm:$0xff pattern:$0x73625140]  ;;  %v3092_v26 = vld.sshfl [vmem:[#allocation1 + $0x38] sm:$0xff pattern:$0x73625140]  ;;  %v972_v2 = vpack.c.bf16 %v3066_v14, %v3066_v14 }
 0x134   :  { %864 = vst [vmem:[#allocation1 + $0x20] ss:$4 sm:$0xff] %v811_v52  ;;  %v2414_v18 = vld [vmem:[%s3474_s3 + $0x130] sm:$0x10]  ;;  %v2425_v52 = vor.u32 %v2613_v17, %v2422_v45  ;;  %v2428_v16 = vld [vmem:[%s3474_s3 + $0x60] sm:$0xf] }
 0x135   :  { %v2417_v30 = vor.u32 %v2612_v0, %v2414_v18  ;;  %v2645_v20 = vld [vmem:[%s3474_s3 + $0x154] sm:$0x10]  ;;  %v2617_v62 = vld [vmem:[%s3474_s3 + $0x7c] sm:$0xf]  ;;  %v2616_v45 = vld [vmem:[%s3474_s3 + $0x74] sm:$0xf]  ;;  %v980_v0 = vpack.c.bf16 %v3088_v24, %v3088_v24 }
 0x136   :  { %v2454_v12 = vld [vmem:[%s3474_s3 + $0x158] sm:$0x10]  ;;  %v2646_v24 = vld [vmem:[%s3474_s3 + $0x15c] sm:$0x10] }
 0x138   :  { %v3112_v44 = vld.sshfl [vmem:[#allocation1] sm:$0xff pattern:$0x73625140]  ;;  %v3114_v34 = vld.sshfl [vmem:[#allocation1 + $0x8] sm:$0xff pattern:$0x73625140] }
 0x139   :  { %v3116_v10 = vld.sshfl [vmem:[#allocation1 + $0x10] sm:$0xff pattern:$0x73625140]  ;;  %v3118_v53 = vld.sshfl [vmem:[#allocation1 + $0x18] sm:$0xff pattern:$0x73625140] }
 0x13a   :  { %873 = vst [vmem:[#allocation1] ss:$4 sm:$0xff] %v812_v28 }
 0x13b   :  { %v3128_v11 = vld.sshfl [vmem:[#allocation1 + $0x20] sm:$0xff pattern:$0x73625140]  ;;  %v3130_v36 = vld.sshfl [vmem:[#allocation1 + $0x28] sm:$0xff pattern:$0x73625140] }
 0x13c   :  { %v3134_v39 = vld.sshfl [vmem:[#allocation1 + $0x30] sm:$0xff pattern:$0x73625140]  ;;  %v3136_v40 = vld.sshfl [vmem:[#allocation1 + $0x38] sm:$0xff pattern:$0x73625140] }
 0x13d   :  { %874 = vst [vmem:[#allocation1 + $0x20] ss:$4 sm:$0xff] %v813_v54  ;;  %v2642_v54 = vld [vmem:[%s3474_s3 + $0x13c] sm:$0x10] }
 0x13f   :  { %1467 = vmatmul.bf16.vlgmr.msrb.gmra.mxu0 %v967_v47  ;;  %v2438_v47 = vld [vmem:[%s3474_s3 + $0x148] sm:$0x10] }
 0x140   :  { %1480 = vmatmul.bf16.vlgmr.msrb.gmra.mxu1 %v968_v46  ;;  %1570 = vmatpush.bf16.xpose.msrb.mxu0 %v2397_v8  ;;  %v2436_v8 = vld [vmem:[%s3474_s3 + $0x68] sm:$0xf]  ;;  %v2429_v46 = vor.u32 %v2642_v54, %v2428_v16  ;;  %v2462_v16 = vld [vmem:[%s3474_s3 + $0x160] sm:$0x10]  ;;  %v983_v54 = vpack.c.bf16 %v3112_v44, %v3112_v44  ;;  %v2476_v44 = vld [vmem:[%s3474_s3 + $0x90] sm:$0xf] }
 0x141   :  { %1493 = vmatmul.bf16.vlgmr.msrb.gmra.mxu2 %v969_v41  ;;  %1506 = vmatmul.bf16.vlgmr.msrb.gmra.mxu3 %v970_v55  ;;  %v3142_v57 = vld.sshfl [vmem:[#allocation1] sm:$0xff pattern:$0x73625140]  ;;  %v3144_v58 = vld.sshfl [vmem:[#allocation1 + $0x8] sm:$0xff pattern:$0x73625140]  ;;  %v975_v41 = vpack.c.bf16 %v3078_v19, %v3078_v19  ;;  %v976_v55 = vpack.c.bf16 %v3080_v51, %v3080_v51 }
 0x142   :  { %1596 = vmatpush.bf16.xpose.msrb.mxu2 %v2405_v37  ;;  %1609 = vmatpush.bf16.xpose.msrb.mxu3 %v2409_v38  ;;  %v3146_v59 = vld.sshfl [vmem:[#allocation1 + $0x10] sm:$0xff pattern:$0x73625140]  ;;  %v3148_v60 = vld.sshfl [vmem:[#allocation1 + $0x18] sm:$0xff pattern:$0x73625140] }
 0x143   :  { %1583 = vmatpush.bf16.xpose.msrb.mxu1 %v2401_v43  ;;  %883 = vst [vmem:[#allocation1] ss:$4 sm:$0xff] %v814_v56  ;;  %v2614_v37 = vld [vmem:[%s3474_s3 + $0x64] sm:$0xf]  ;;  %v2437_v43 = vor.u32 %v2643_v9, %v2436_v8  ;;  %v2441_v56 = vor.u32 %v2615_v35, %v2438_v47  ;;  %v2444_v19 = vld [vmem:[%s3474_s3 + $0x70] sm:$0xf]  ;;  %v984_v8 = vpack.c.bf16 %v3114_v34, %v3114_v34 }
 0x144   :  { %v3150_v5 = vld.sshfl [vmem:[#allocation1 + $0x20] sm:$0xff pattern:$0x73625140]  ;;  %v3152_v6 = vld.sshfl [vmem:[#allocation1 + $0x28] sm:$0xff pattern:$0x73625140]  ;;  %v985_v47 = vpack.c.bf16 %v3116_v10, %v3116_v10 }
 0x145   :  { %v3154_v7 = vld.sshfl [vmem:[#allocation1 + $0x30] sm:$0xff pattern:$0x73625140]  ;;  %v3156_v22 = vld.sshfl [vmem:[#allocation1 + $0x38] sm:$0xff pattern:$0x73625140] }
 0x146   :  { %884 = vst [vmem:[#allocation1 + $0x20] ss:$4 sm:$0xff] %v815_v42  ;;  %v2430_v38 = vld [vmem:[%s3474_s3 + $0x140] sm:$0x10]  ;;  %v977_v42 = vpack.c.bf16 %v3082_v3, %v3082_v3  ;;  %v2644_v51 = vld [vmem:[%s3474_s3 + $0x14c] sm:$0x10] }
 0x147   :  { %v2433_v61 = vor.u32 %v2614_v37, %v2430_v38  ;;  %v2452_v3 = vld [vmem:[%s3474_s3 + $0x78] sm:$0xf]  ;;  %v2445_v17 = vor.u32 %v2644_v51, %v2444_v19  ;;  %v2648_v34 = vld [vmem:[%s3474_s3 + $0x16c] sm:$0x10]  ;;  %v2621_v38 = vld [vmem:[%s3474_s3 + $0x9c] sm:$0xf]  ;;  %v989_v51 = vpack.c.bf16 %v3134_v39, %v3134_v39 }
 0x148   :  { %v2453_v18 = vor.u32 %v2645_v20, %v2452_v3  ;;  %v2484_v10 = vld [vmem:[%s3474_s3 + $0x98] sm:$0xf]  ;;  %v990_v3 = vpack.c.bf16 %v3136_v40, %v3136_v40  ;;  %v2650_v39 = vld [vmem:[%s3474_s3 + $0x17c] sm:$0x10]  ;;  %v2500_v40 = vld [vmem:[%s3474_s3 + $0xa8] sm:$0xf] }
 0x14a   :  { %v3184_v50 = vld.sshfl [vmem:[#allocation1] sm:$0xff pattern:$0x73625140]  ;;  %v3186_v1 = vld.sshfl [vmem:[#allocation1 + $0x8] sm:$0xff pattern:$0x73625140] }
 0x14b   :  { %v3190_v27 = vld.sshfl [vmem:[#allocation1 + $0x10] sm:$0xff pattern:$0x73625140]  ;;  %v3192_v28 = vld.sshfl [vmem:[#allocation1 + $0x18] sm:$0xff pattern:$0x73625140] }
 0x14c   :  { %893 = vst [vmem:[#allocation1] ss:$4 sm:$0xff] %v816_v48  ;;  %v2446_v48 = vld [vmem:[%s3474_s3 + $0x150] sm:$0x10] }
 0x14d   :  { %v3198_v14 = vld.sshfl [vmem:[#allocation1 + $0x20] sm:$0xff pattern:$0x73625140]  ;;  %v3200_v31 = vld.sshfl [vmem:[#allocation1 + $0x28] sm:$0xff pattern:$0x73625140] }
 0x14e   :  { %v3202_v33 = vld.sshfl [vmem:[#allocation1 + $0x30] sm:$0xff pattern:$0x73625140]  ;;  %v3204_v15 = vld.sshfl [vmem:[#allocation1 + $0x38] sm:$0xff pattern:$0x73625140] }
 0x14f   :  { %1519 = vmatmul.bf16.vlgmr.msra.gmra.mxu0 %v971_v49  ;;  %894 = vst [vmem:[#allocation1 + $0x20] ss:$4 sm:$0xff] %v817_v32  ;;  %v2457_v49 = vor.u32 %v2617_v62, %v2454_v12  ;;  %v2618_v32 = vld [vmem:[%s3474_s3 + $0x84] sm:$0xf]  ;;  %v2651_v62 = vld [vmem:[%s3474_s3 + $0x184] sm:$0x10] }
 0x150   :  { %1532 = vmatmul.bf16.vlgmr.msra.gmra.mxu1 %v972_v2  ;;  %1622 = vmatpush.bf16.xpose.msra.mxu0 %v2413_v63  ;;  %v979_v63 = vpack.c.bf16 %v3086_v4, %v3086_v4  ;;  %v981_v2 = vpack.c.bf16 %v3090_v25, %v3090_v25  ;;  %v2460_v4 = vld [vmem:[%s3474_s3 + $0x80] sm:$0xf]  ;;  %v2468_v25 = vld [vmem:[%s3474_s3 + $0x88] sm:$0xf]  ;;  %v2465_v37 = vor.u32 %v2618_v32, %v2462_v16  ;;  %v2623_v12 = vld [vmem:[%s3474_s3 + $0xac] sm:$0xf] }
 0x151   :  { %1545 = vmatmul.bf16.vlgmr.msra.gmra.mxu2 %v973_v29  ;;  %1558 = vmatmul.bf16.vlgmr.msra.gmra.mxu3 %v974_v13  ;;  %v2619_v29 = vld [vmem:[%s3474_s3 + $0x8c] sm:$0xf] }
 0x152   :  { %1648 = vmatpush.bf16.xpose.msra.mxu2 %v2421_v21  ;;  %1661 = vmatpush.bf16.xpose.msra.mxu3 %v2425_v52  ;;  %v982_v21 = vpack.c.bf16 %v3092_v26, %v3092_v26  ;;  %v2449_v52 = vor.u32 %v2616_v45, %v2446_v48  ;;  %v2647_v26 = vld [vmem:[%s3474_s3 + $0x164] sm:$0x10]  ;;  %v2470_v13 = vld [vmem:[%s3474_s3 + $0x168] sm:$0x10] }
 0x153   :  { %1635 = vmatpush.bf16.xpose.msra.mxu1 %v2417_v30  ;;  %v2461_v30 = vor.u32 %v2646_v24, %v2460_v4  ;;  %v2469_v9 = vor.u32 %v2647_v26, %v2468_v25  ;;  %v2473_v35 = vor.u32 %v2619_v29, %v2470_v13  ;;  %v993_v25 = vpack.c.bf16 %v3146_v59, %v3146_v59  ;;  %v2508_v59 = vld [vmem:[%s3474_s3 + $0xb0] sm:$0xf] }
 0x154   :  { %v994_v26 = vpack.c.bf16 %v3148_v60, %v3148_v60  ;;  %v2652_v60 = vld [vmem:[%s3474_s3 + $0x18c] sm:$0x10] }
 0x15f   :  { %1571 = vmatmul.bf16.vlgmr.msrb.gmra.mxu0 %v975_v41  ;;  %v2486_v41 = vld [vmem:[%s3474_s3 + $0x178] sm:$0x10] }
 0x160   :  { %1584 = vmatmul.bf16.vlgmr.msrb.gmra.mxu1 %v976_v55  ;;  %1674 = vmatpush.bf16.xpose.msrb.mxu0 %v2429_v46  ;;  %v986_v46 = vpack.c.bf16 %v3118_v53, %v3118_v53  ;;  %v2649_v53 = vld [vmem:[%s3474_s3 + $0x174] sm:$0x10]  ;;  %v2477_v55 = vor.u32 %v2648_v34, %v2476_v44  ;;  %v2489_v19 = vor.u32 %v2621_v38, %v2486_v41  ;;  %v2624_v44 = vld [vmem:[%s3474_s3 + $0xb4] sm:$0xf] }
 0x161   :  { %1597 = vmatmul.bf16.vlgmr.msrb.gmra.mxu2 %v977_v42  ;;  %1610 = vmatmul.bf16.vlgmr.msrb.gmra.mxu3 %v978_v23  ;;  %v987_v42 = vpack.c.bf16 %v3128_v11, %v3128_v11  ;;  %v988_v23 = vpack.c.bf16 %v3130_v36, %v3130_v36  ;;  %v2669_v11 = vld [vmem:[%s3475_s4] ss:$0 sm:$0xff]  ;;  %v2510_v34 = vld [vmem:[%s3474_s3 + $0x190] sm:$0x10]  ;;  %v995_v38 = vpack.c.bf16 %v3150_v5, %v3150_v5 }
 0x162   :  { %1700 = vmatpush.bf16.xpose.msrb.mxu2 %v2437_v43  ;;  %1713 = vmatpush.bf16.xpose.msrb.mxu3 %v2441_v56  ;;  %v2620_v43 = vld [vmem:[%s3474_s3 + $0x94] sm:$0xf]  ;;  %v2492_v36 = vld [vmem:[%s3474_s3 + $0xa0] sm:$0xf] }
 0x163   :  { %1687 = vmatpush.bf16.xpose.msrb.mxu1 %v2433_v61  ;;  %v2478_v56 = vld [vmem:[%s3474_s3 + $0x170] sm:$0x10]  ;;  %v2485_v61 = vor.u32 %v2649_v53, %v2484_v10  ;;  %v2493_v48 = vor.u32 %v2650_v39, %v2492_v36  ;;  %v2532_v36 = vld [vmem:[%s3474_s3 + $0xc8] sm:$0xf] }
 0x164   :  { %v2481_v20 = vor.u32 %v2620_v43, %v2478_v56  ;;  %v2655_v39 = vld [vmem:[%s3474_s3 + $0x1a4] sm:$0x10] }
 0x16f   :  { %1623 = vmatmul.bf16.vlgmr.msra.gmra.mxu0 %v979_v63  ;;  %v2622_v63 = vld [vmem:[%s3474_s3 + $0xa4] sm:$0xf] }
 0x170   :  { %1636 = vmatmul.bf16.vlgmr.msra.gmra.mxu1 %v980_v0  ;;  %1726 = vmatpush.bf16.xpose.msra.mxu0 %v2445_v17  ;;  %v2502_v17 = vld [vmem:[%s3474_s3 + $0x188] sm:$0x10]  ;;  %v2494_v0 = vld [vmem:[%s3474_s3 + $0x180] sm:$0x10] }
 0x171   :  { %1649 = vmatmul.bf16.vlgmr.msra.gmra.mxu2 %v981_v2  ;;  %1662 = vmatmul.bf16.vlgmr.msra.gmra.mxu3 %v982_v21  ;;  %v991_v2 = vpack.c.bf16 %v3142_v57, %v3142_v57  ;;  %v992_v21 = vpack.c.bf16 %v3144_v58, %v3144_v58  ;;  %v2505_v4 = vor.u32 %v2623_v12, %v2502_v17 }
 0x172   :  { %1752 = vmatpush.bf16.xpose.msra.mxu2 %v2453_v18  ;;  %1765 = vmatpush.bf16.xpose.msra.mxu3 %v2457_v49  ;;  %v2497_v29 = vor.u32 %v2622_v63, %v2494_v0  ;;  %v2526_v63 = vld [vmem:[%s3474_s3 + $0x1a0] sm:$0x10] }
 0x173   :  { %1739 = vmatpush.bf16.xpose.msra.mxu1 %v2449_v52  ;;  %v2501_v52 = vor.u32 %v2651_v62, %v2500_v40  ;;  %v2627_v40 = vld [vmem:[%s3474_s3 + $0xcc] sm:$0xf] }
 0x174   :  { %v2534_v62 = vld [vmem:[%s3474_s3 + $0x1a8] sm:$0x10] }
 0x17f   :  { %1675 = vmatmul.bf16.vlgmr.msrb.gmra.mxu0 %v983_v54  ;;  %v2516_v54 = vld [vmem:[%s3474_s3 + $0xb8] sm:$0xf] }
 0x180   :  { %1688 = vmatmul.bf16.vlgmr.msrb.gmra.mxu1 %v984_v8  ;;  %1778 = vmatpush.bf16.xpose.msrb.mxu0 %v2461_v30  ;;  %v2653_v8 = vld [vmem:[%s3474_s3 + $0x194] sm:$0x10] }
 0x181   :  { %1701 = vmatmul.bf16.vlgmr.msrb.gmra.mxu2 %v985_v47  ;;  %1714 = vmatmul.bf16.vlgmr.msrb.gmra.mxu3 %v986_v46  ;;  %v2517_v43 = vor.u32 %v2653_v8, %v2516_v54 }
 0x182   :  { %1804 = vmatpush.bf16.xpose.msrb.mxu2 %v2469_v9  ;;  %1817 = vmatpush.bf16.xpose.msrb.mxu3 %v2473_v35  ;;  %v2625_v9 = vld [vmem:[%s3474_s3 + $0xbc] sm:$0xf] }
 0x183   :  { %1791 = vmatpush.bf16.xpose.msrb.mxu1 %v2465_v37  ;;  %v2518_v35 = vld [vmem:[%s3474_s3 + $0x198] sm:$0x10]  ;;  %v2509_v37 = vor.u32 %v2652_v60, %v2508_v59 }
 0x184   :  { %v2521_v56 = vor.u32 %v2625_v9, %v2518_v35  ;;  %v2629_v59 = vld [vmem:[%s3474_s3 + $0xdc] sm:$0xf]  ;;  %v2628_v35 = vld [vmem:[%s3474_s3 + $0xd4] sm:$0xf] }
 0x185   :  { %v2550_v60 = vld [vmem:[%s3474_s3 + $0x1b8] sm:$0x10] }
 0x18f   :  { %1727 = vmatmul.bf16.vlgmr.msra.gmra.mxu0 %v987_v42  ;;  %v997_v42 = vpack.c.bf16 %v3154_v7, %v3154_v7  ;;  %v2524_v7 = vld [vmem:[%s3474_s3 + $0xc0] sm:$0xf] }
 0x190   :  { %1740 = vmatmul.bf16.vlgmr.msra.gmra.mxu1 %v988_v23  ;;  %1830 = vmatpush.bf16.xpose.msra.mxu0 %v2477_v55  ;;  %v996_v55 = vpack.c.bf16 %v3152_v6, %v3152_v6  ;;  %v998_v23 = vpack.c.bf16 %v3156_v22, %v3156_v22  ;;  %v2654_v22 = vld [vmem:[%s3474_s3 + $0x19c] sm:$0x10] }
 0x191   :  { %1753 = vmatmul.bf16.vlgmr.msra.gmra.mxu2 %v989_v51  ;;  %1766 = vmatmul.bf16.vlgmr.msra.gmra.mxu3 %v990_v3 }
 0x192   :  { %1856 = vmatpush.bf16.xpose.msra.mxu2 %v2485_v61  ;;  %1869 = vmatpush.bf16.xpose.msra.mxu3 %v2489_v19  ;;  %v2513_v61 = vor.u32 %v2624_v44, %v2510_v34  ;;  %v1003_v44 = vpack.c.bf16 %v3198_v14, %v3198_v14 }
 0x193   :  { %1843 = vmatpush.bf16.xpose.msra.mxu1 %v2481_v20 }
 0x19c   :  { %v1364_v45 = vpop.f32.mrf.mxu0 }
 0x19d   :  { %v1365_v18 = vadd.f32 %v2669_v11, %v1364_v45  ;;  %v1377_v49 = vpop.f32.mrf.mxu1  ;;  %v2525_v45 = vor.u32 %v2654_v22, %v2524_v7 }
 0x19f   :  { %v1378_v24 = vadd.f32 %v1377_v49, %v1365_v18  ;;  %1779 = vmatmul.bf16.vlgmr.msrb.gmra.mxu0 %v991_v2  ;;  %v999_v49 = vpack.c.bf16 %v3184_v50, %v3184_v50 }
 0x1a0   :  { %1792 = vmatmul.bf16.vlgmr.msrb.gmra.mxu1 %v992_v21  ;;  %1882 = vmatpush.bf16.xpose.msrb.mxu0 %v2493_v48  ;;  %v2626_v48 = vld [vmem:[%s3474_s3 + $0xc4] sm:$0xf]  ;;  %v1000_v21 = vpack.c.bf16 %v3186_v1, %v3186_v1 }
 0x1a1   :  { %1805 = vmatmul.bf16.vlgmr.msrb.gmra.mxu2 %v993_v25  ;;  %1818 = vmatmul.bf16.vlgmr.msrb.gmra.mxu3 %v994_v26  ;;  %v1002_v25 = vpack.c.bf16 %v3192_v28, %v3192_v28  ;;  %v2529_v26 = vor.u32 %v2626_v48, %v2526_v63  ;;  %v2656_v28 = vld [vmem:[%s3474_s3 + $0x1ac] sm:$0x10] }
 0x1a2   :  { %1908 = vmatpush.bf16.xpose.msrb.mxu2 %v2501_v52  ;;  %1921 = vmatpush.bf16.xpose.msrb.mxu3 %v2505_v4  ;;  %v2533_v52 = vor.u32 %v2655_v39, %v2532_v36  ;;  %v2537_v4 = vor.u32 %v2627_v40, %v2534_v62 }
 0x1a3   :  { %1895 = vmatpush.bf16.xpose.msrb.mxu1 %v2497_v29 }
 0x1a4   :  { %v1390_v57 = vpop.f32.mrf.mxu2  ;;  %v1403_v58 = vpop.f32.mrf.mxu3 }
 0x1a5   :  { %v1391_v13 = vadd.f32 %v1390_v57, %v1378_v24  ;;  %v1366_v30 = vpop.f32.mrf.mxu0  ;;  %v1379_v32 = vpop.f32.mrf.mxu1  ;;  %v1001_v24 = vpack.c.bf16 %v3190_v27, %v3190_v27  ;;  %v2540_v27 = vld [vmem:[%s3474_s3 + $0xd0] sm:$0xf] }
 0x1a6   :  { %v2548_v32 = vld [vmem:[%s3474_s3 + $0xd8] sm:$0xf]  ;;  %v2541_v9 = vor.u32 %v2656_v28, %v2540_v27 }
 0x1a7   :  { %v1404_v16 = vadd.f32 %v1403_v58, %v1391_v13 }
 0x1ac   :  { %v1392_v47 = vpop.f32.mrf.mxu2  ;;  %v1405_v46 = vpop.f32.mrf.mxu3 }
 0x1ad   :  { %v1416_v10 = vpop.f32.mrf.mxu0  ;;  %v1429_v53 = vpop.f32.mrf.mxu1  ;;  %v2542_v47 = vld [vmem:[%s3474_s3 + $0x1b0] sm:$0x10] }
 0x1ae   :  { %v1417_v41 = vadd.f32 %v1416_v10, %v1404_v16  ;;  %v2657_v16 = vld [vmem:[%s3474_s3 + $0x1b4] sm:$0x10]  ;;  %v1004_v10 = vpack.c.bf16 %v3200_v31, %v3200_v31  ;;  %s2734_s3 = smov [#allocation7]  }
 0x1af   :  { %1831 = vmatmul.bf16.vlgmr.msra.gmra.mxu0 %v995_v38  ;;  %v2553_v38 = vor.u32 %v2629_v59, %v2550_v60  ;;  %s2102_s2 = sshll.u32 %s2734_s3, 4  ;;  %s2103_s2 = int_to_ptr.vmem [resolvable:$true] %s2102_s2 }
 0x1b0   :  { %v1430_v19 = vadd.f32 %v1429_v53, %v1417_v41  ;;  %1844 = vmatmul.bf16.vlgmr.msra.gmra.mxu1 %v996_v55  ;;  %1934 = vmatpush.bf16.xpose.msra.mxu0 %v2509_v37  ;;  %v2549_v53 = vor.u32 %v2657_v16, %v2548_v32  ;;  %v1005_v41 = vpack.c.bf16 %v3202_v33, %v3202_v33  ;;  %v896_v33 = vld.sshfl [vmem:[#allocation1 + $0x8] sm:$0xff pattern:$0x73625140] }
 0x1b1   :  { %1857 = vmatmul.bf16.vlgmr.msra.gmra.mxu2 %v997_v42  ;;  %1870 = vmatmul.bf16.vlgmr.msra.gmra.mxu3 %v998_v23  ;;  %v1006_v55 = vpack.c.bf16 %v3204_v15, %v3204_v15  ;;  %v897_v15 = vld.sshfl [vmem:[#allocation1 + $0x10] sm:$0xff pattern:$0x73625140]  ;;  %v1008_v36 = vpack.c.bf16 %v896_v33, %v896_v33 }
 0x1b2   :  { %1960 = vmatpush.bf16.xpose.msra.mxu2 %v2517_v43  ;;  %1973 = vmatpush.bf16.xpose.msra.mxu3 %v2521_v56  ;;  %v2545_v43 = vor.u32 %v2628_v35, %v2542_v47  ;;  %v1009_v39 = vpack.c.bf16 %v897_v15, %v897_v15 }
 0x1b3   :  { %1947 = vmatpush.bf16.xpose.msra.mxu1 %v2513_v61 }
 0x1b4   :  { %v1442_v5 = vpop.f32.mrf.mxu2  ;;  %v1455_v6 = vpop.f32.mrf.mxu3 }
 0x1b5   :  { %v1443_v51 = vadd.f32 %v1442_v5, %v1430_v19  ;;  %v1418_v3 = vpop.f32.mrf.mxu0  ;;  %v1431_v20 = vpop.f32.mrf.mxu1  ;;  %v895_v5 = vld.sshfl [vmem:[#allocation1] sm:$0xff pattern:$0x73625140] }
 0x1b6   :  { %v898_v3 = vld.sshfl [vmem:[#allocation1 + $0x18] sm:$0xff pattern:$0x73625140]  ;;  %v1007_v7 = vpack.c.bf16 %v895_v5, %v895_v5 }
 0x1b7   :  { %v1456_v11 = vadd.f32 %v1455_v6, %v1443_v51  ;;  %v1010_v40 = vpack.c.bf16 %v898_v3, %v898_v3 }
 0x1bc   :  { %v1444_v12 = vpop.f32.mrf.mxu2  ;;  %v1457_v17 = vpop.f32.mrf.mxu3 }
 0x1bd   :  { %v1468_v0 = vpop.f32.mrf.mxu0  ;;  %v1481_v18 = vpop.f32.mrf.mxu1 }
 0x1be   :  { %v1469_v2 = vadd.f32 %v1468_v0, %v1456_v11 }
 0x1bf   :  { %1883 = vmatmul.bf16.vlgmr.msrb.gmra.mxu0 %v999_v49  ;;  %v900_v49 = vld.sshfl [vmem:[#allocation1 + $0x28] sm:$0xff pattern:$0x73625140] }
 0x1c0   :  { %v1482_v29 = vadd.f32 %v1481_v18, %v1469_v2  ;;  %1896 = vmatmul.bf16.vlgmr.msrb.gmra.mxu1 %v1000_v21  ;;  %1986 = vmatpush.bf16.xpose.msrb.mxu0 %v2525_v45  ;;  %v899_v18 = vld.sshfl [vmem:[#allocation1 + $0x20] sm:$0xff pattern:$0x73625140] }
 0x1c1   :  { %1909 = vmatmul.bf16.vlgmr.msrb.gmra.mxu2 %v1001_v24  ;;  %1922 = vmatmul.bf16.vlgmr.msrb.gmra.mxu3 %v1002_v25 }
 0x1c2   :  { %2012 = vmatpush.bf16.xpose.msrb.mxu2 %v2533_v52  ;;  %2025 = vmatpush.bf16.xpose.msrb.mxu3 %v2537_v4  ;;  %v901_v52 = vld.sshfl [vmem:[#allocation1 + $0x30] sm:$0xff pattern:$0x73625140]  ;;  %v902_v4 = vld.sshfl [vmem:[#allocation1 + $0x38] sm:$0xff pattern:$0x73625140] }
 0x1c3   :  { %1999 = vmatpush.bf16.xpose.msrb.mxu1 %v2529_v26  ;;  %v1011_v26 = vpack.c.bf16 %v899_v18, %v899_v18 }
 0x1c4   :  { %v1494_v50 = vpop.f32.mrf.mxu2  ;;  %v1507_v1 = vpop.f32.mrf.mxu3 }
 0x1c5   :  { %v1495_v57 = vadd.f32 %v1494_v50, %v1482_v29  ;;  %v1470_v58 = vpop.f32.mrf.mxu0  ;;  %v1483_v13 = vpop.f32.mrf.mxu1  ;;  %v1012_v50 = vpack.c.bf16 %v900_v49, %v900_v49 }
 0x1c7   :  { %v1508_v30 = vadd.f32 %v1507_v1, %v1495_v57  ;;  %v1013_v1 = vpack.c.bf16 %v901_v52, %v901_v52  ;;  %v1014_v57 = vpack.c.bf16 %v902_v4, %v902_v4 }
 0x1cc   :  { %v1496_v54 = vpop.f32.mrf.mxu2  ;;  %v1509_v8 = vpop.f32.mrf.mxu3 }
 0x1cd   :  { %v1520_v46 = vpop.f32.mrf.mxu0  ;;  %v1533_v37 = vpop.f32.mrf.mxu1 }
 0x1ce   :  { %v1521_v34 = vadd.f32 %v1520_v46, %v1508_v30 }
 0x1cf   :  { %1935 = vmatmul.bf16.vlgmr.msra.gmra.mxu0 %v1003_v44 }
 0x1d0   :  { %v1534_v56 = vadd.f32 %v1533_v37, %v1521_v34  ;;  %1948 = vmatmul.bf16.vlgmr.msra.gmra.mxu1 %v1004_v10  ;;  %2038 = vmatpush.bf16.xpose.msra.mxu0 %v2541_v9 }
 0x1d1   :  { %1961 = vmatmul.bf16.vlgmr.msra.gmra.mxu2 %v1005_v41  ;;  %1974 = vmatmul.bf16.vlgmr.msra.gmra.mxu3 %v1006_v55 }
 0x1d2   :  { %2064 = vmatpush.bf16.xpose.msra.mxu2 %v2549_v53  ;;  %2077 = vmatpush.bf16.xpose.msra.mxu3 %v2553_v38 }
 0x1d3   :  { %2051 = vmatpush.bf16.xpose.msra.mxu1 %v2545_v43 }
 0x1d4   :  { %v1546_v14 = vpop.f32.mrf.mxu2  ;;  %v1559_v31 = vpop.f32.mrf.mxu3 }
 0x1d5   :  { %v1547_v42 = vadd.f32 %v1546_v14, %v1534_v56  ;;  %v1522_v23 = vpop.f32.mrf.mxu0  ;;  %v1535_v61 = vpop.f32.mrf.mxu1 }
 0x1d7   :  { %v1560_v19 = vadd.f32 %v1559_v31, %v1547_v42 }
 0x1dc   :  { %v1548_v6 = vpop.f32.mrf.mxu2  ;;  %v1561_v51 = vpop.f32.mrf.mxu3 }
 0x1dd   :  { %v1572_v20 = vpop.f32.mrf.mxu0  ;;  %v1585_v11 = vpop.f32.mrf.mxu1 }
 0x1de   :  { %v1573_v22 = vadd.f32 %v1572_v20, %v1560_v19 }
 0x1df   :  { %1987 = vmatmul.bf16.vlgmr.msrb.gmra.mxu0 %v1007_v7 }
 0x1e0   :  { %v1586_v62 = vadd.f32 %v1585_v11, %v1573_v22  ;;  %2000 = vmatmul.bf16.vlgmr.msrb.gmra.mxu1 %v1008_v36 }
 0x1e1   :  { %2013 = vmatmul.bf16.vlgmr.msrb.gmra.mxu2 %v1009_v39  ;;  %2026 = vmatmul.bf16.vlgmr.msrb.gmra.mxu3 %v1010_v40 }
 0x1e4   :  { %v1598_v12 = vpop.f32.mrf.mxu2  ;;  %v1611_v17 = vpop.f32.mrf.mxu3 }
 0x1e5   :  { %v1599_v45 = vadd.f32 %v1598_v12, %v1586_v62  ;;  %v1574_v48 = vpop.f32.mrf.mxu0  ;;  %v1587_v63 = vpop.f32.mrf.mxu1 }
 0x1e7   :  { %v1612_v0 = vadd.f32 %v1611_v17, %v1599_v45 }
 0x1ec   :  { %v1600_v2 = vpop.f32.mrf.mxu2  ;;  %v1613_v21 = vpop.f32.mrf.mxu3 }
 0x1ed   :  { %v1624_v24 = vpop.f32.mrf.mxu0  ;;  %v1637_v25 = vpop.f32.mrf.mxu1 }
 0x1ee   :  { %v1625_v29 = vadd.f32 %v1624_v24, %v1612_v0 }
 0x1ef   :  { %2039 = vmatmul.bf16.vlgmr.msra.gmra.mxu0 %v1011_v26 }
 0x1f0   :  { %v1638_v58 = vadd.f32 %v1637_v25, %v1625_v29  ;;  %2052 = vmatmul.bf16.vlgmr.msra.gmra.mxu1 %v1012_v50 }
 0x1f1   :  { %2065 = vmatmul.bf16.vlgmr.msra.gmra.mxu2 %v1013_v1  ;;  %2078 = vmatmul.bf16.vlgmr.msra.gmra.mxu3 %v1014_v57 }
 0x1f4   :  { %v1650_v13 = vpop.f32.mrf.mxu2  ;;  %v1663_v30 = vpop.f32.mrf.mxu3 }
 0x1f5   :  { %v1651_v27 = vadd.f32 %v1650_v13, %v1638_v58  ;;  %v1626_v28 = vpop.f32.mrf.mxu0  ;;  %v1639_v32 = vpop.f32.mrf.mxu1 }
 0x1f7   :  { %v1664_v16 = vadd.f32 %v1663_v30, %v1651_v27 }
 0x1fc   :  { %v1652_v59 = vpop.f32.mrf.mxu2  ;;  %v1665_v60 = vpop.f32.mrf.mxu3 }
 0x1fd   :  { %v1676_v54 = vpop.f32.mrf.mxu0  ;;  %v1689_v8 = vpop.f32.mrf.mxu1 }
 0x1fe   :  { %v1677_v43 = vadd.f32 %v1676_v54, %v1664_v16 }
 0x200   :  { %v1690_v23 = vadd.f32 %v1689_v8, %v1677_v43 }
 0x204   :  { %v1702_v9 = vpop.f32.mrf.mxu2  ;;  %v1715_v35 = vpop.f32.mrf.mxu3 }
 0x205   :  { %v1678_v47 = vpop.f32.mrf.mxu0  ;;  %v1691_v46 = vpop.f32.mrf.mxu1  ;;  %v1703_v61 = vadd.f32 %v1702_v9, %v1690_v23 }
 0x207   :  { %v1716_v33 = vadd.f32 %v1715_v35, %v1703_v61 }
 0x20c   :  { %v1704_v37 = vpop.f32.mrf.mxu2  ;;  %v1717_v44 = vpop.f32.mrf.mxu3 }
 0x20d   :  { %v1728_v34 = vpop.f32.mrf.mxu0  ;;  %v1741_v10 = vpop.f32.mrf.mxu1 }
 0x20e   :  { %v1729_v15 = vadd.f32 %v1728_v34, %v1716_v33 }
 0x210   :  { %v1742_v3 = vadd.f32 %v1741_v10, %v1729_v15 }
 0x214   :  { %v1754_v53 = vpop.f32.mrf.mxu2  ;;  %v1767_v38 = vpop.f32.mrf.mxu3 }
 0x215   :  { %v1730_v41 = vpop.f32.mrf.mxu0  ;;  %v1743_v55 = vpop.f32.mrf.mxu1  ;;  %v1755_v7 = vadd.f32 %v1754_v53, %v1742_v3 }
 0x217   :  { %v1768_v39 = vadd.f32 %v1767_v38, %v1755_v7 }
 0x21c   :  { %v1756_v56 = vpop.f32.mrf.mxu2  ;;  %v1769_v14 = vpop.f32.mrf.mxu3 }
 0x21d   :  { %v1780_v31 = vpop.f32.mrf.mxu0  ;;  %v1793_v42 = vpop.f32.mrf.mxu1 }
 0x21e   :  { %v1781_v40 = vadd.f32 %v1780_v31, %v1768_v39 }
 0x220   :  { %v1794_v48 = vadd.f32 %v1793_v42, %v1781_v40 }
 0x224   :  { %v1806_v19 = vpop.f32.mrf.mxu2  ;;  %v1819_v5 = vpop.f32.mrf.mxu3 }
 0x225   :  { %v1782_v6 = vpop.f32.mrf.mxu0  ;;  %v1795_v51 = vpop.f32.mrf.mxu1  ;;  %v1807_v63 = vadd.f32 %v1806_v19, %v1794_v48 }
 0x227   :  { %v1820_v49 = vadd.f32 %v1819_v5, %v1807_v63 }
 0x22c   :  { %v1808_v20 = vpop.f32.mrf.mxu2  ;;  %v1821_v11 = vpop.f32.mrf.mxu3 }
 0x22d   :  { %v1832_v22 = vpop.f32.mrf.mxu0  ;;  %v1845_v36 = vpop.f32.mrf.mxu1 }
 0x22e   :  { %v1833_v52 = vadd.f32 %v1832_v22, %v1820_v49 }
 0x230   :  { %v1846_v4 = vadd.f32 %v1845_v36, %v1833_v52 }
 0x234   :  { %v1858_v62 = vpop.f32.mrf.mxu2  ;;  %v1871_v12 = vpop.f32.mrf.mxu3 }
 0x235   :  { %v1834_v17 = vpop.f32.mrf.mxu0  ;;  %v1847_v45 = vpop.f32.mrf.mxu1  ;;  %v1859_v26 = vadd.f32 %v1858_v62, %v1846_v4 }
 0x237   :  { %v1872_v1 = vadd.f32 %v1871_v12, %v1859_v26 }
 0x23c   :  { %v1860_v0 = vpop.f32.mrf.mxu2  ;;  %v1873_v18 = vpop.f32.mrf.mxu3 }
 0x23d   :  { %v1884_v2 = vpop.f32.mrf.mxu0  ;;  %v1897_v21 = vpop.f32.mrf.mxu1 }
 0x23e   :  { %v1885_v57 = vadd.f32 %v1884_v2, %v1872_v1 }
 0x240   :  { %v1898_v28 = vadd.f32 %v1897_v21, %v1885_v57 }
 0x244   :  { %v1910_v24 = vpop.f32.mrf.mxu2  ;;  %v1923_v25 = vpop.f32.mrf.mxu3 }
 0x245   :  { %v1886_v29 = vpop.f32.mrf.mxu0  ;;  %v1899_v50 = vpop.f32.mrf.mxu1  ;;  %v1911_v32 = vadd.f32 %v1910_v24, %v1898_v28 }
 0x247   :  { %v1924_v60 = vadd.f32 %v1923_v25, %v1911_v32 }
 0x24c   :  { %v1912_v58 = vpop.f32.mrf.mxu2  ;;  %v1925_v13 = vpop.f32.mrf.mxu3 }
 0x24d   :  { %v1936_v30 = vpop.f32.mrf.mxu0  ;;  %v1949_v27 = vpop.f32.mrf.mxu1 }
 0x24e   :  { %v1937_v9 = vadd.f32 %v1936_v30, %v1924_v60 }
 0x250   :  { %v1950_v35 = vadd.f32 %v1949_v27, %v1937_v9 }
 0x254   :  { %v1962_v16 = vpop.f32.mrf.mxu2  ;;  %v1975_v59 = vpop.f32.mrf.mxu3 }
 0x255   :  { %v1938_v54 = vpop.f32.mrf.mxu0  ;;  %v1951_v8 = vpop.f32.mrf.mxu1  ;;  %v1963_v37 = vadd.f32 %v1962_v16, %v1950_v35 }
 0x257   :  { %v1976_v10 = vadd.f32 %v1975_v59, %v1963_v37 }
 0x25c   :  { %v1964_v47 = vpop.f32.mrf.mxu2  ;;  %v1977_v46 = vpop.f32.mrf.mxu3 }
 0x25d   :  { %v1988_v44 = vpop.f32.mrf.mxu0  ;;  %v2001_v34 = vpop.f32.mrf.mxu1 }
 0x25e   :  { %v1989_v53 = vadd.f32 %v1988_v44, %v1976_v10 }
 0x260   :  { %v2002_v56 = vadd.f32 %v2001_v34, %v1989_v53 }
 0x264   :  { %v2014_v38 = vpop.f32.mrf.mxu2  ;;  %v2027_v41 = vpop.f32.mrf.mxu3 }
 0x265   :  { %v1990_v55 = vpop.f32.mrf.mxu0  ;;  %v2003_v43 = vpop.f32.mrf.mxu1  ;;  %v2015_v14 = vadd.f32 %v2014_v38, %v2002_v56 }
 0x267   :  { %v2028_v23 = vadd.f32 %v2027_v41, %v2015_v14 }
 0x26c   :  { %v2016_v31 = vpop.f32.mrf.mxu2  ;;  %v2029_v42 = vpop.f32.mrf.mxu3 }
 0x26d   :  { %v2040_v61 = vpop.f32.mrf.mxu0  ;;  %v2053_v19 = vpop.f32.mrf.mxu1 }
 0x26e   :  { %v2041_v5 = vadd.f32 %v2040_v61, %v2028_v23 }
 0x270   :  { %v2054_v33 = vadd.f32 %v2053_v19, %v2041_v5 }
 0x274   :  { %v2066_v6 = vpop.f32.mrf.mxu2  ;;  %v2079_v51 = vpop.f32.mrf.mxu3 }
 0x275   :  { %v2067_v15 = vadd.f32 %v2066_v6, %v2054_v33  ;;  %v2042_v3 = vpop.f32.mrf.mxu0  ;;  %v2055_v20 = vpop.f32.mrf.mxu1 }
 0x277   :  { %v2080_v11 = vadd.f32 %v2079_v51, %v2067_v15 }
 0x279   :  { %v2084_v7 = vsel %vm2083_vm4, %v2080_v11, -inf }
 0x27a   :  { %2085 = vmax.xlane.f32.xlu0 %v2084_v7 }
 0x27c   :  { %v2068_v22 = vpop.f32.mrf.mxu2  ;;  %v2081_v36 = vpop.f32.mrf.mxu3 }
 0x2ed   :  { %v2086_v39 = vpop.xlane.xlu0 %2085 }
 0x2ee   :  { %v2087_v40 = vsub.f32 %v2080_v11, %v2086_v39 }
 0x2f0   :  { %v2088_v62 = vmul.f32 1.442695, %v2087_v40 }
 0x2f2   :  { %2670 = vpow2.f32 %v2088_v62 }
 0x2f8   :  { %v2671_v12 = vpop.eup %2670 }
 0x2f9   :  { %v2090_v17 = vsel %vm2083_vm4, %v2671_v12, 0.0 }
 0x2fa   :  { %2091 = vadd.xlane.f32.xlu0 %v2090_v17 }
 0x36d   :  { %v2092_v45 = vpop.xlane.xlu0 %2091 }
 0x36e   :  { %2672 = vlog2.f32 %v2092_v45 }
 0x374   :  { %v2673_v48 = vpop.eup %2672 }
 0x375   :  { %v2094_v63 = vmul.f32 0.6931472, %v2673_v48 }
 0x377   :  { %v2095_v0 = vsub.f32 %v2087_v40, %v2094_v63 }
 0x379   :  { %2096 = vst.msk [vmem:[#allocation7] sm:$0x3] %vm2083_vm4, %v2095_v0 }
 0x37a   :  { %2107 = dma.vmem_to_hbm [thread:$0]  %s2103_s2, 32, %s2105_s14, [#allocation6]  }
 0x37b   :  { %2728 = dma.done.wait [#allocation6], 32  }
 0x37c   :  { %2729 = vsyncadd [#allocation6], 4294967264 }
 0x37d   :  { %2112 = vsyncpa [#allocation5], 1 }
 0x37e   :  { %2113 = vsyncpa [#allocation6], 1 }

</bundles_post_ra>
